<compile_context>
chip_gen: v6e
topology: v6e:2x2x1
jax: 0.10.0
libtpu: 0.0.40
codegen_flags: <defaults>
</compile_context>

<pallas_src>
import functools
import math

import jax
import jax.numpy as jnp
from jax.experimental import pallas as pl
from jax.experimental.pallas import tpu as pltpu


# ----------------------------------------------------------------------------
# VMEM budget / tiling helpers
# ----------------------------------------------------------------------------
def _vmem_budget_bytes():
    """Conservative per-core VMEM budget (70% of capacity, clamped)."""
    cap = 64 * 1024 * 1024  # v7x per-TensorCore VMEM (smallest across gens)
    try:
        info = pltpu.get_tpu_info()
        cap = int(getattr(info, "vmem_capacity_bytes", cap) or cap)
    except Exception:
        pass
    budget = int(cap * 0.7)
    return max(40 * 1024 * 1024, min(budget, 90 * 1024 * 1024))


def _pick_spatial_tile(hw, c, elem_bytes, max_block_bytes):
    """Largest lane-aligned (multiple-of-128) spatial tile whose (1, c, tile)
    block stays under max_block_bytes, capped at hw rounded up to 128."""
    cap = (max_block_bytes // (elem_bytes * max(c, 1))) // 128 * 128
    cap = max(cap, 128)
    hw_up = -(-hw // 128) * 128
    return min(cap, hw_up)


# ----------------------------------------------------------------------------
# Fused single-pass kernel: pool + attention MLP + gate, one HBM round trip.
#
# All dense layers are expressed as broadcast-multiply + reduce, alternating
# between "column in -> row out" (reduce over sublanes) and "row in -> column
# out" (reduce over lanes), so no matmul / reshape / concat lowering is needed
# and the final gate is naturally a (C, 1) column that broadcasts over the
# lane-resident spatial axis.
# ----------------------------------------------------------------------------
def _fused_qca_kernel(attrs_row_ref, attrs_col_ref, *refs,
                      style, inv_hw, n_params):
    param_refs = refs[:n_params]
    x_ref = refs[n_params]
    out_ref = refs[n_params + 1]
    f32 = jnp.float32

    def dcol(h_col, w_ref):            # (K,1) x (K,N) -> (1,N) row
        return jnp.sum(h_col * w_ref[...].astype(f32), axis=0, keepdims=True)

    def drow(h_row, wT_ref):           # (1,K) x (N,K) -> (N,1) column
        return jnp.sum(h_row * wT_ref[...].astype(f32), axis=1, keepdims=True)

    relu = lambda t: jnp.maximum(t, 0.0)
    sigmoid = lambda t: 1.0 / (1.0 + jnp.exp(-t))

    attrs_row = attrs_row_ref[0].astype(f32)      # (1, M)
    attrs_col = attrs_col_ref[0].astype(f32)      # (M, 1)

    # Global average pool -> (C, 1) column (C stays on sublanes, no relayout).
    pooled_col = jnp.sum(x_ref[...].astype(f32), axis=-1,
                         keepdims=True)[0] * inv_hw

    if style in ("standard", "modulate"):
        w0, b0, w1t, b1 = param_refs
        h = relu(dcol(pooled_col, w0) + b0[...].astype(f32))
        g = sigmoid(drow(h, w1t) + b1[...].astype(f32))
        if style == "modulate":
            g = g * attrs_col
    elif style in ("max_concat", "softmax"):
        w0m, w0a, b0, w1t, b1 = param_refs
        h = relu(dcol(pooled_col, w0m) + dcol(attrs_col, w0a)
                 + b0[...].astype(f32))
        g = sigmoid(drow(h, w1t) + b1[...].astype(f32))
        if style == "softmax":
            z = g - jnp.max(g, axis=0, keepdims=True)
            e = jnp.exp(z)
            g = e / jnp.sum(e, axis=0, keepdims=True)
    elif style == "mini_concat":
        wp, bp, w1mt, w1at, b1 = param_refs
        h = dcol(pooled_col, wp) + bp[...].astype(f32)   # ReLU comes after cat
        g = sigmoid(drow(relu(h), w1mt) + drow(relu(attrs_row), w1at)
                    + b1[...].astype(f32))
    elif style == "extended_attention":
        (w1m, w1a, b1, w2mt, w2at, b2,
         w3m, w3a, b3, wft, bf) = param_refs
        h = relu(dcol(pooled_col, w1m) + dcol(attrs_col, w1a)
                 + b1[...].astype(f32))
        h = relu(drow(h, w2mt) + drow(attrs_row, w2at) + b2[...].astype(f32))
        h = relu(dcol(h, w3m) + dcol(attrs_col, w3a) + b3[...].astype(f32))
        g = sigmoid(drow(h, wft) + bf[...].astype(f32))
    else:
        raise NotImplementedError(style)

    # Gate the resident tile: (1, C, HW) * (1, C, 1).
    out_ref[...] = x_ref[...] * g[None].astype(out_ref.dtype)


def _prepare_fused_params(params, style, channel):
    """Flatten / split / transpose the 1x1-conv weights so the in-kernel MLP
    needs no concatenation and alternates column-in / row-in dense layers."""
    row = lambda b: b.reshape(1, -1)
    col = lambda b: b.reshape(-1, 1)
    if style in ("standard", "modulate"):
        w0, b0 = params["du0"]
        w1, b1 = params["du1"]
        return [w0, row(b0), w1.T, col(b1)]
    if style in ("max_concat", "softmax"):
        w0, b0 = params["du0"]
        w1, b1 = params["du1"]
        return [w0[:channel], w0[channel:], row(b0), w1.T, col(b1)]
    if style == "mini_concat":
        wp, bp = params["pre_concat"]
        w1, b1 = params["du1"]
        cr = wp.shape[1]
        return [wp, row(bp), w1[:cr].T, w1[cr:].T, col(b1)]
    if style == "extended_attention":
        (w1, b1), (w2, b2), (w3, b3) = params["feature_convs"]
        wf, bf = params["final"]
        c2, c4 = channel // 2, channel // 4
        return [w1[:channel], w1[channel:], row(b1),
                w2[:c2].T, w2[c2:].T, col(b2),
                w3[:c4], w3[c4:], row(b3),
                wf.T, col(bf)]
    raise NotImplementedError(style)


def _qca_fused(params, x, attributes, *, style, vmem_limit, in_place):
    B, C, H, W = x.shape
    hw = H * W
    xf = x.reshape(B, C, hw)
    attrs = attributes.reshape(B, -1).astype(jnp.float32)
    M = attrs.shape[1]
    attrs_row = attrs.reshape(B, 1, M)
    attrs_col = attrs.reshape(B, M, 1)
    flat = _prepare_fused_params(params, style, C)
    n_params = len(flat)

    kernel = functools.partial(_fused_qca_kernel, style=style,
                               inv_hw=1.0 / hw, n_params=n_params)
    param_specs = [pl.BlockSpec(p.shape, lambda b: (0, 0)) for p in flat]
    io_alias = {2 + n_params: 0} if in_place else {}

    out = pl.pallas_call(
        kernel,
        out_shape=jax.ShapeDtypeStruct((B, C, hw), x.dtype),
        grid=(B,),
        in_specs=[pl.BlockSpec((1, 1, M), lambda b: (b, 0, 0)),
                  pl.BlockSpec((1, M, 1), lambda b: (b, 0, 0)),
                  *param_specs,
                  pl.BlockSpec((1, C, hw), lambda b: (b, 0, 0))],
        out_specs=pl.BlockSpec((1, C, hw), lambda b: (b, 0, 0)),
        input_output_aliases=io_alias,
        compiler_params=pltpu.CompilerParams(
            dimension_semantics=("parallel",),
            vmem_limit_bytes=vmem_limit),
    )(attrs_row, attrs_col, *flat, xf)
    return out.reshape(B, C, H, W)


# ----------------------------------------------------------------------------
# Two-pass fallback kernels (large H*W): Pallas pool + plain-JAX MLP + Pallas gate
# ----------------------------------------------------------------------------
def _gap_kernel(x_ref, out_ref, *, hw, tile):
    """Partial spatial sums.  x_ref: (1, C, tile); out_ref: (1, 1, C, 1)
    accumulator, resident across the innermost (spatial) grid axis."""
    p = pl.program_id(1)
    s = pl.program_id(2)
    n_sp = pl.num_programs(2)

    @pl.when(s == 0)
    def _():
        out_ref[...] = jnp.zeros_like(out_ref)

    xb = x_ref[...].astype(jnp.float32)
    start = (p * n_sp + s) * tile
    lane = jax.lax.broadcasted_iota(jnp.int32, xb.shape, dimension=2) + start
    xb = jnp.where(lane < hw, xb, 0.0)           # mask the (padded) tail tile
    out_ref[...] += jnp.sum(xb, axis=-1, keepdims=True)[None]


def _gate_kernel(x_ref, g_ref, out_ref):
    """out = x * per-channel gate (gate broadcast along the lane axis)."""
    out_ref[...] = x_ref[...] * g_ref[...].astype(x_ref.dtype)


def global_avg_pool(x, *, max_block_bytes, vmem_limit):
    """x: (B, C, H, W) -> (B, C) float32 mean over spatial dims (Pallas)."""
    B, C, H, W = x.shape
    hw = H * W
    xf = x.reshape(B, C, hw)
    ts = _pick_spatial_tile(hw, C, x.dtype.itemsize, max_block_bytes)
    n_s = -(-hw // ts)
    # Split the spatial reduction into P=2 parallel partial sums when it
    # divides evenly, so both v7x TensorCores are busy even with small B.
    if n_s % 2 == 0:
        P, n_sp = 2, n_s // 2
    else:
        P, n_sp = 1, n_s

    kernel = functools.partial(_gap_kernel, hw=hw, tile=ts)
    partial_sums = pl.pallas_call(
        kernel,
        out_shape=jax.ShapeDtypeStruct((P, B, C, 1), jnp.float32),
        grid=(B, P, n_sp),
        in_specs=[pl.BlockSpec((1, C, ts), lambda b, p, s: (b, 0, p * n_sp + s))],
        out_specs=pl.BlockSpec((1, 1, C, 1), lambda b, p, s: (p, b, 0, 0)),
        compiler_params=pltpu.CompilerParams(
            dimension_semantics=("parallel", "parallel", "arbitrary"),
            vmem_limit_bytes=vmem_limit),
    )(xf)
    return partial_sums.sum(axis=(0, 3)) * (1.0 / hw)          # (B, C) f32


def apply_channel_gate(x, gate, *, max_block_bytes, vmem_limit, in_place):
    """x: (B, C, H, W), gate: (B, C) -> x * gate[:, :, None, None] (Pallas)."""
    B, C, H, W = x.shape
    hw = H * W
    xf = x.reshape(B, C, hw)
    g = gate.reshape(B, C, 1).astype(x.dtype)
    ts = _pick_spatial_tile(hw, C, x.dtype.itemsize, max_block_bytes)
    n_s = -(-hw // ts)
    out = pl.pallas_call(
        _gate_kernel,
        out_shape=jax.ShapeDtypeStruct((B, C, hw), x.dtype),
        grid=(B, n_s),
        in_specs=[pl.BlockSpec((1, C, ts), lambda b, s: (b, 0, s)),
                  pl.BlockSpec((1, C, 1), lambda b, s: (b, 0, 0))],
        out_specs=pl.BlockSpec((1, C, ts), lambda b, s: (b, 0, s)),
        input_output_aliases=({0: 0} if in_place else {}),
        compiler_params=pltpu.CompilerParams(
            dimension_semantics=("parallel", "parallel"),
            vmem_limit_bytes=vmem_limit),
    )(xf, g)
    return out.reshape(B, C, H, W)


# ----------------------------------------------------------------------------
# Tiny attention MLP in plain JAX (used by the two-pass path and the reference)
# ----------------------------------------------------------------------------
def _dense(y, wb):
    w, b = wb
    return y @ w + b


def qca_attention(params, pooled, attrs, style):
    if style in ("standard", "modulate"):
        h = jax.nn.relu(_dense(pooled, params["du0"]))
        g = jax.nn.sigmoid(_dense(h, params["du1"]))
        if style == "modulate":
            g = g * attrs
    elif style in ("max_concat", "softmax"):
        y = jnp.concatenate([pooled, attrs], axis=1)
        h = jax.nn.relu(_dense(y, params["du0"]))
        g = jax.nn.sigmoid(_dense(h, params["du1"]))
        if style == "softmax":
            g = jax.nn.softmax(g, axis=1)
    elif style == "mini_concat":
        h = _dense(pooled, params["pre_concat"])
        h = jax.nn.relu(jnp.concatenate([h, attrs], axis=1))
        g = jax.nn.sigmoid(_dense(h, params["du1"]))
    elif style == "extended_attention":
        h = pooled
        for wb in params["feature_convs"]:
            h = jax.nn.relu(_dense(jnp.concatenate([h, attrs], axis=1), wb))
        g = jax.nn.sigmoid(_dense(h, params["final"]))
    else:
        raise NotImplementedError(style)
    return g


# ----------------------------------------------------------------------------
# Parameter init (1x1 convs stored as dense (fan_in, fan_out) matrices)
# ----------------------------------------------------------------------------
def _init_dense(key, fan_in, fan_out):
    wk, bk = jax.random.split(key)
    bound = 1.0 / math.sqrt(fan_in)
    w = jax.random.uniform(wk, (fan_in, fan_out), jnp.float32, -bound, bound)
    b = jax.random.uniform(bk, (fan_out,), jnp.float32, -bound, bound)
    return w, b


def init_qca_params(key, channel, style, reduction=16, num_metadata=1):
    if reduction < 16:
        raise RuntimeError("Using an extreme channel attention reduction value")
    cr = channel // reduction
    if style in ("modulate", "mini_concat", "standard"):
        channel_in = channel
    else:
        channel_in = channel + num_metadata
    keys = jax.random.split(key, 6)
    p = {}
    if style in ("modulate", "max_concat", "softmax", "standard"):
        p["du0"] = _init_dense(keys[0], channel_in, cr)
        p["du1"] = _init_dense(keys[1], cr, channel)
    elif style == "mini_concat":
        p["pre_concat"] = _init_dense(keys[0], channel_in, cr)
        p["du1"] = _init_dense(keys[1], cr + num_metadata, channel)
    elif style == "extended_attention":
        fracs = [(channel_in, channel // 2),
                 (channel // 2 + num_metadata, channel // 4),
                 (channel // 4 + num_metadata, cr)]
        p["feature_convs"] = [_init_dense(keys[i], a, b)
                              for i, (a, b) in enumerate(fracs)]
        p["final"] = _init_dense(keys[3], cr, channel)
    else:
        raise NotImplementedError(style)
    return p


# ----------------------------------------------------------------------------
# QCALayer forward
# ----------------------------------------------------------------------------
def qcalayer_forward_pallas(params, x, attributes, *, style,
                            force_two_pass=False,
                            max_block_bytes=4 * 1024 * 1024,
                            in_place=False):
    """x: (B, C, H, W), attributes: (B, num_metadata, 1, 1) -> (B, C, H, W)."""
    B, C, H, W = x.shape
    hw = H * W
    budget = _vmem_budget_bytes()
    slab = C * hw * x.dtype.itemsize
    p_bytes = sum(int(l.size) * l.dtype.itemsize
                  for l in jax.tree_util.tree_leaves(params))
    # Double-buffered input + output slabs + params must fit the VMEM budget.
    fused_fits = 4 * slab + 2 * p_bytes + (2 << 20) <= budget

    if fused_fits and not force_two_pass:
        return _qca_fused(params, x, attributes, style=style,
                          vmem_limit=budget, in_place=in_place)

    # Two-pass fallback for very large feature maps.
    attrs = attributes.reshape(B, -1).astype(jnp.float32)
    pooled = global_avg_pool(x, max_block_bytes=max_block_bytes,
                             vmem_limit=budget)
    gate = qca_attention(params, pooled, attrs, style)
    return apply_channel_gate(x, gate, max_block_bytes=max_block_bytes,
                              vmem_limit=budget, in_place=in_place)


# Pure-JAX reference (for correctness check only)
def qcalayer_forward_ref(params, x, attributes, *, style):
    B = x.shape[0]
    attrs = attributes.reshape(B, -1).astype(jnp.float32)
    pooled = jnp.mean(x.astype(jnp.float32), axis=(2, 3))
    gate = qca_attention(params, pooled, attrs, style)
    return x * gate[:, :, None, None].astype(x.dtype)


# ----------------------------------------------------------------------------
if __name__ == "__main__":
    REDUCTION, NUM_META = 16, 1
    styles = ("standard", "modulate", "max_concat", "mini_concat",
              "softmax", "extended_attention")

    key = jax.random.PRNGKey(0)
    kx, ka, kp = jax.random.split(key, 3)

    def run_case(style, shape, seed, **kw):
        B, C, H, W = shape
        x = jax.random.normal(jax.random.fold_in(kx, seed), shape, jnp.float32)
        attributes = jax.random.uniform(jax.random.fold_in(ka, seed),
                                        (B, NUM_META, 1, 1), jnp.float32)
        params = init_qca_params(jax.random.fold_in(kp, seed), C, style,
                                 REDUCTION, NUM_META)
        fwd = jax.jit(functools.partial(qcalayer_forward_pallas,
                                        style=style, **kw))
        out = jax.block_until_ready(fwd(params, x, attributes))
        ref = qcalayer_forward_ref(params, x, attributes, style=style)
        assert out.shape == x.shape, (style, out.shape)
        if not bool(jnp.allclose(out, ref, rtol=1e-4, atol=1e-5)):
            err = float(jnp.max(jnp.abs(out - ref)))
            raise AssertionError(
                f"mismatch: style={style} kw={kw} max_abs_err={err}")

    # Fused single-pass path (per-batch slab trivially fits VMEM here).
    for i, style in enumerate(styles):
        run_case(style, (2, 64, 64, 64), i)

    # Two-pass fallback, forced small spatial tiles to exercise:
    #  * multi-tile accumulation + P=2 parallel partial sums (hw=2304, ts=128)
    #  * masked / clipped tail tile (hw=1600, ts=256 -> 7 tiles) and the
    #    in-place gating alias, with B=1.
    run_case("max_concat", (2, 64, 48, 48), 100,
             force_two_pass=True, max_block_bytes=128 * 64 * 4)
    run_case("standard", (1, 64, 40, 40), 101,
             force_two_pass=True, max_block_bytes=256 * 64 * 4, in_place=True)

    print("KERNEL_OK")
</pallas_src>

<mosaic_0001>
module attributes {stable_mosaic.version = 11 : i64} {
  func.func @_fused_qca_kernel(%arg0: i32, %arg1: memref<1x1x1xf32, #tpu.memory_space<vmem>>, %arg2: memref<1x1x1xf32, #tpu.memory_space<vmem>>, %arg3: memref<64x4xf32, #tpu.memory_space<vmem>>, %arg4: memref<1x4xf32, #tpu.memory_space<vmem>>, %arg5: memref<64x4xf32, #tpu.memory_space<vmem>>, %arg6: memref<64x1xf32, #tpu.memory_space<vmem>>, %arg7: memref<1x64x4096xf32, #tpu.memory_space<vmem>>, %arg8: memref<1x64x4096xf32, #tpu.memory_space<vmem>>) attributes {dimension_semantics = [#tpu.dimension_semantics<parallel>], iteration_bounds = array<i64: 2>, scalar_prefetch = 0 : i64, scratch_operands = 0 : i64, tpu.core_type = #tpu.core_type<tc>, window_params = [{transform_indices = @transform_0, window_bounds = array<i64: 1, 1, 1>}, {transform_indices = @transform_1, window_bounds = array<i64: 1, 1, 1>}, {pipeline_mode = #tpu.pipeline_mode<synchronous>, transform_indices = @transform_2, window_bounds = array<i64: 64, 4>}, {pipeline_mode = #tpu.pipeline_mode<synchronous>, transform_indices = @transform_3, window_bounds = array<i64: 1, 4>}, {pipeline_mode = #tpu.pipeline_mode<synchronous>, transform_indices = @transform_4, window_bounds = array<i64: 64, 4>}, {pipeline_mode = #tpu.pipeline_mode<synchronous>, transform_indices = @transform_5, window_bounds = array<i64: 64, 1>}, {transform_indices = @transform_6, window_bounds = array<i64: 1, 64, 4096>}, {transform_indices = @transform_7, window_bounds = array<i64: 1, 64, 4096>}]} {
    %c0 = arith.constant 0 : index
    %c0_0 = arith.constant 0 : index
    %c0_1 = arith.constant 0 : index
    %0 = vector.load %arg7[%c0, %c0_0, %c0_1] : memref<1x64x4096xf32, #tpu.memory_space<vmem>>, vector<1x64x4096xf32>
    %cst = arith.constant dense<0.000000e+00> : vector<1x64xf32>
    %1 = vector.multi_reduction <add>, %0, %cst [2] : vector<1x64x4096xf32> to vector<1x64xf32>
    %2 = vector.shape_cast %1 : vector<1x64xf32> to vector<1x64x1xf32>
    %3 = vector.shape_cast %2 : vector<1x64x1xf32> to vector<64x1xf32>
    %cst_2 = arith.constant 2.44140625E-4 : f32
    %4 = vector.broadcast %cst_2 : f32 to vector<64x1xf32>
    %5 = arith.mulf %3, %4 : vector<64x1xf32>
    %c0_3 = arith.constant 0 : index
    %c0_4 = arith.constant 0 : index
    %6 = vector.load %arg3[%c0_3, %c0_4] : memref<64x4xf32, #tpu.memory_space<vmem>>, vector<64x4xf32>
    %7 = vector.broadcast %5 : vector<64x1xf32> to vector<64x4xf32>
    %8 = arith.mulf %7, %6 : vector<64x4xf32>
    %cst_5 = arith.constant dense<0.000000e+00> : vector<4xf32>
    %9 = vector.multi_reduction <add>, %8, %cst_5 [0] : vector<64x4xf32> to vector<4xf32>
    %10 = vector.shape_cast %9 : vector<4xf32> to vector<1x4xf32>
    %c0_6 = arith.constant 0 : index
    %c0_7 = arith.constant 0 : index
    %11 = vector.load %arg4[%c0_6, %c0_7] : memref<1x4xf32, #tpu.memory_space<vmem>>, vector<1x4xf32>
    %12 = arith.addf %10, %11 : vector<1x4xf32>
    %cst_8 = arith.constant 0.000000e+00 : f32
    %13 = vector.broadcast %cst_8 : f32 to vector<1x4xf32>
    %14 = arith.maximumf %12, %13 : vector<1x4xf32>
    %c0_9 = arith.constant 0 : index
    %c0_10 = arith.constant 0 : index
    %15 = vector.load %arg5[%c0_9, %c0_10] : memref<64x4xf32, #tpu.memory_space<vmem>>, vector<64x4xf32>
    %16 = vector.broadcast %14 : vector<1x4xf32> to vector<64x4xf32>
    %17 = arith.mulf %16, %15 : vector<64x4xf32>
    %cst_11 = arith.constant dense<0.000000e+00> : vector<64xf32>
    %18 = vector.multi_reduction <add>, %17, %cst_11 [1] : vector<64x4xf32> to vector<64xf32>
    %19 = vector.shape_cast %18 : vector<64xf32> to vector<64x1xf32>
    %c0_12 = arith.constant 0 : index
    %c0_13 = arith.constant 0 : index
    %20 = vector.load %arg6[%c0_12, %c0_13] : memref<64x1xf32, #tpu.memory_space<vmem>>, vector<64x1xf32>
    %21 = arith.addf %19, %20 : vector<64x1xf32>
    %cst_14 = arith.constant 0.000000e+00 : f32
    %22 = vector.broadcast %cst_14 : f32 to vector<64x1xf32>
    %23 = arith.subf %22, %21 : vector<64x1xf32>
    %24 = math.exp %23 : vector<64x1xf32>
    %cst_15 = arith.constant 1.000000e+00 : f32
    %25 = vector.broadcast %cst_15 : f32 to vector<64x1xf32>
    %26 = arith.addf %25, %24 : vector<64x1xf32>
    %cst_16 = arith.constant 1.000000e+00 : f32
    %27 = vector.broadcast %cst_16 : f32 to vector<64x1xf32>
    %28 = arith.divf %27, %26 : vector<64x1xf32>
    %c0_17 = arith.constant 0 : index
    %c0_18 = arith.constant 0 : index
    %c0_19 = arith.constant 0 : index
    %29 = vector.load %arg7[%c0_17, %c0_18, %c0_19] : memref<1x64x4096xf32, #tpu.memory_space<vmem>>, vector<1x64x4096xf32>
    %30 = vector.shape_cast %28 : vector<64x1xf32> to vector<1x64x1xf32>
    %31 = vector.broadcast %30 : vector<1x64x1xf32> to vector<1x64x4096xf32>
    %32 = arith.mulf %29, %31 : vector<1x64x4096xf32>
    %c0_20 = arith.constant 0 : index
    %c0_21 = arith.constant 0 : index
    %c0_22 = arith.constant 0 : index
    %33 = vector.load %arg8[%c0_20, %c0_21, %c0_22] : memref<1x64x4096xf32, #tpu.memory_space<vmem>>, vector<1x64x4096xf32>
    tpu.vector_store %arg8[%c0_20, %c0_21, %c0_22], %32 {strides = array<i32>} : memref<1x64x4096xf32, #tpu.memory_space<vmem>>, vector<1x64x4096xf32>,
    return
  }
  func.func @transform_0(%arg0: i32) -> (i32, i32, i32) {
    %c0_i32 = arith.constant 0 : i32
    %c0_i32_0 = arith.constant 0 : i32
    %c0_i32_1 = arith.constant 0 : i32
    return %arg0, %c0_i32, %c0_i32_0 : i32, i32, i32
  }
  func.func @transform_1(%arg0: i32) -> (i32, i32, i32) {
    %c0_i32 = arith.constant 0 : i32
    %c0_i32_0 = arith.constant 0 : i32
    %c0_i32_1 = arith.constant 0 : i32
    return %arg0, %c0_i32, %c0_i32_0 : i32, i32, i32
  }
  func.func @transform_2(%arg0: i32) -> (i32, i32) {
    %c0_i32 = arith.constant 0 : i32
    %c0_i32_0 = arith.constant 0 : i32
    %c0_i32_1 = arith.constant 0 : i32
    return %c0_i32, %c0_i32_0 : i32, i32
  }
  func.func @transform_3(%arg0: i32) -> (i32, i32) {
    %c0_i32 = arith.constant 0 : i32
    %c0_i32_0 = arith.constant 0 : i32
    %c0_i32_1 = arith.constant 0 : i32
    return %c0_i32, %c0_i32_0 : i32, i32
  }
  func.func @transform_4(%arg0: i32) -> (i32, i32) {
    %c0_i32 = arith.constant 0 : i32
    %c0_i32_0 = arith.constant 0 : i32
    %c0_i32_1 = arith.constant 0 : i32
    return %c0_i32, %c0_i32_0 : i32, i32
  }
  func.func @transform_5(%arg0: i32) -> (i32, i32) {
    %c0_i32 = arith.constant 0 : i32
    %c0_i32_0 = arith.constant 0 : i32
    %c0_i32_1 = arith.constant 0 : i32
    return %c0_i32, %c0_i32_0 : i32, i32
  }
  func.func @transform_6(%arg0: i32) -> (i32, i32, i32) {
    %c0_i32 = arith.constant 0 : i32
    %c0_i32_0 = arith.constant 0 : i32
    %c0_i32_1 = arith.constant 0 : i32
    return %arg0, %c0_i32, %c0_i32_0 : i32, i32, i32
  }
  func.func @transform_7(%arg0: i32) -> (i32, i32, i32) {
    %c0_i32 = arith.constant 0 : i32
    %c0_i32_0 = arith.constant 0 : i32
    %c0_i32_1 = arith.constant 0 : i32
    return %arg0, %c0_i32, %c0_i32_0 : i32, i32, i32
  }
}

</mosaic_0001>

<bundles_post_ra>
// kernel: qcalayer_forward_pallas.1
= control target key start
LH: loop header
LB: loop body
LE: loop exit
PB: predicated region body
PF: predicated region fallthrough
CT: control target
= control target key end

     0   :  { %s1961_s23 = smov 0   ;;  %s3147_s0 = inlined_call_operand.vmem [shape: f32[2,1,1], index: 0, kind: input, shape index: {}, may-alias: {0,1}]   ;;  %s3148_s1 = inlined_call_operand.vmem [shape: f32[2,1,1], index: 1, kind: input, shape index: {}, may-alias: {0,1}]   ;;  %s3149_s2 = inlined_call_operand.vmem [shape: f32[64,4], index: 2, kind: input, shape index: {}]   ;;  %s3150_s3 = inlined_call_operand.vmem [shape: f32[1,4], index: 3, kind: input, shape index: {}]   ;;  %s3151_s4 = inlined_call_operand.vmem [shape: f32[64,4], index: 4, kind: input, shape index: {}]   ;;  %s3152_s5 = inlined_call_operand.vmem [shape: f32[64,1], index: 5, kind: input, shape index: {}]   ;;  %s3153_s6 = inlined_call_operand.vmem [shape: f32[2,64,4096], index: 6, kind: input, shape index: {}]   ;;  %s3154_s7 = inlined_call_operand.vmem [shape: f32[2,64,4096], index: 7, kind: output, shape index: {}]  }
   0x1 LB: > { %s1609_s1 = sadd.s32 4294967295, %s1918_s23   ;;  %p1613_p0 = scmp.ge.s32.totalorder %s1918_s23, 1  ;;  %s1918_s23 = sphi %s1961_s23, %s17_s23  }
   0x2   : > { %p253_p1 = scmp.lt.s32.totalorder %s1918_s23, 3 }
   0x4   : > { %p254_p2 = pnand %p1613_p0, %p253_p1 }
   0x5   : > { %p297_p3 = scmp.lt.s32.totalorder (!%p254_p2), %s1609_s1, 1 }
   0x6   : > { %257 = sbr.rel (%p254_p2) target bundleno = 735 (0x2df), region = 48 }
   0xb   : > { %s3156_s1 = smov (!%p297_p3, %s1609_s1), 1  ;;  %vm851_vm0 = vcmask 31744  }
   0xc   : > { %s1620_s24 = sshll.u32 %s3156_s1, 11 }
   0xd   : > { %s1977_s27 = scalar_lea.vmem %s3153_s6, %s1620_s24  ;;  %s2358_s15 = scalar_lea.vmem %s3154_s7, %s1620_s24 }
   0xe   : > { %v307_v0 = vld [vmem:[%s1977_s27] sm:$0xff]  ;;  %v308_v1 = vld [vmem:[%s1977_s27 + $0x8] sm:$0xff]  ;;  %v309_v2 = vld [vmem:[%s1977_s27 + $0x10] sm:$0xff] }
   0xf   : > { %v563_v3 = vadd.f32 %v308_v1, %v307_v0  ;;  %v310_v4 = vld [vmem:[%s1977_s27 + $0x18] sm:$0xff]  ;;  %v311_v6 = vld [vmem:[%s1977_s27 + $0x20] sm:$0xff]  ;;  %v312_v8 = vld [vmem:[%s1977_s27 + $0x28] sm:$0xff] }
  0x10   : > { %v313_v10 = vld [vmem:[%s1977_s27 + $0x30] sm:$0xff]  ;;  %v314_v12 = vld [vmem:[%s1977_s27 + $0x38] sm:$0xff]  ;;  %v371_v13 = vld [vmem:[%s1977_s27 + $0x200] sm:$0xff] }
  0x11   : > { %v564_v5 = vadd.f32 %v563_v3, %v309_v2  ;;  %v372_v15 = vld [vmem:[%s1977_s27 + $0x208] sm:$0xff]  ;;  %v373_v16 = vld [vmem:[%s1977_s27 + $0x210] sm:$0xff]  ;;  %v315_v17 = vld [vmem:[%s1977_s27 + $0x40] sm:$0xff] }
  0x12   : > { %v629_v18 = vadd.f32 %v372_v15, %v371_v13  ;;  %v374_v20 = vld [vmem:[%s1977_s27 + $0x218] sm:$0xff]  ;;  %v316_v21 = vld [vmem:[%s1977_s27 + $0x48] sm:$0xff]  ;;  %v375_v24 = vld [vmem:[%s1977_s27 + $0x220] sm:$0xff] }
  0x13   : > { %v565_v7 = vadd.f32 %v564_v5, %v310_v4  ;;  %v317_v25 = vld [vmem:[%s1977_s27 + $0x50] sm:$0xff]  ;;  %v376_v28 = vld [vmem:[%s1977_s27 + $0x228] sm:$0xff]  ;;  %v318_v29 = vld [vmem:[%s1977_s27 + $0x58] sm:$0xff] }
  0x14   : > { %v630_v22 = vadd.f32 %v629_v18, %v373_v16  ;;  %v377_v32 = vld [vmem:[%s1977_s27 + $0x230] sm:$0xff]  ;;  %v319_v33 = vld [vmem:[%s1977_s27 + $0x60] sm:$0xff]  ;;  %v378_v36 = vld [vmem:[%s1977_s27 + $0x238] sm:$0xff] }
  0x15   : > { %v566_v9 = vadd.f32 %v565_v7, %v311_v6  ;;  %v339_v37 = vld [vmem:[%s1977_s27 + $0x100] sm:$0xff]  ;;  %v340_v38 = vld [vmem:[%s1977_s27 + $0x108] sm:$0xff]  ;;  %v341_v41 = vld [vmem:[%s1977_s27 + $0x110] sm:$0xff] }
  0x16   : > { %v631_v26 = vadd.f32 %v630_v22, %v374_v20  ;;  %v320_v39 = vld [vmem:[%s1977_s27 + $0x68] sm:$0xff]  ;;  %v596_v42 = vadd.f32 %v340_v38, %v339_v37  ;;  %v379_v44 = vld [vmem:[%s1977_s27 + $0x240] sm:$0xff]  ;;  %v342_v45 = vld [vmem:[%s1977_s27 + $0x118] sm:$0xff] }
  0x17   : > { %v567_v11 = vadd.f32 %v566_v9, %v312_v8  ;;  %v321_v46 = vld [vmem:[%s1977_s27 + $0x70] sm:$0xff]  ;;  %v380_v50 = vld [vmem:[%s1977_s27 + $0x248] sm:$0xff]  ;;  %v343_v51 = vld [vmem:[%s1977_s27 + $0x120] sm:$0xff] }
  0x18   : > { %v632_v30 = vadd.f32 %v631_v26, %v375_v24  ;;  %v597_v48 = vadd.f32 %v596_v42, %v341_v41  ;;  %v322_v52 = vld [vmem:[%s1977_s27 + $0x78] sm:$0xff]  ;;  %v381_v56 = vld [vmem:[%s1977_s27 + $0x250] sm:$0xff]  ;;  %v344_v57 = vld [vmem:[%s1977_s27 + $0x128] sm:$0xff] }
  0x19   : > { %v568_v14 = vadd.f32 %v567_v11, %v313_v10  ;;  %v323_v58 = vld [vmem:[%s1977_s27 + $0x80] sm:$0xff]  ;;  %v382_v62 = vld [vmem:[%s1977_s27 + $0x258] sm:$0xff]  ;;  %v345_v63 = vld [vmem:[%s1977_s27 + $0x130] sm:$0xff] }
  0x1a   : > { %v633_v34 = vadd.f32 %v632_v30, %v376_v28  ;;  %v598_v54 = vadd.f32 %v597_v48, %v342_v45  ;;  %v324_v0 = vld [vmem:[%s1977_s27 + $0x88] sm:$0xff]  ;;  %v325_v3 = vld [vmem:[%s1977_s27 + $0x90] sm:$0xff]  ;;  %v383_v5 = vld [vmem:[%s1977_s27 + $0x260] sm:$0xff] }
  0x1b   : > { %v569_v19 = vadd.f32 %v568_v14, %v314_v12  ;;  %v346_v6 = vld [vmem:[%s1977_s27 + $0x138] sm:$0xff]  ;;  %v403_v9 = vld [vmem:[%s1977_s27 + $0x300] sm:$0xff]  ;;  %v404_v10 = vld [vmem:[%s1977_s27 + $0x308] sm:$0xff] }
  0x1c   : > { %v634_v40 = vadd.f32 %v633_v34, %v377_v32  ;;  %v599_v60 = vadd.f32 %v598_v54, %v343_v51  ;;  %v405_v11 = vld [vmem:[%s1977_s27 + $0x310] sm:$0xff]  ;;  %v384_v13 = vld [vmem:[%s1977_s27 + $0x268] sm:$0xff]  ;;  %v347_v14 = vld [vmem:[%s1977_s27 + $0x140] sm:$0xff]  ;;  %v662_v15 = vadd.f32 %v404_v10, %v403_v9 }
  0x1d   : > { %v570_v23 = vadd.f32 %v569_v19, %v315_v17  ;;  %v326_v16 = vld [vmem:[%s1977_s27 + $0x98] sm:$0xff]  ;;  %v348_v22 = vld [vmem:[%s1977_s27 + $0x148] sm:$0xff]  ;;  %v327_v24 = vld [vmem:[%s1977_s27 + $0xa0] sm:$0xff] }
  0x1e   : > { %v635_v47 = vadd.f32 %v634_v40, %v378_v36  ;;  %v600_v2 = vadd.f32 %v599_v60, %v344_v57  ;;  %v406_v19 = vld [vmem:[%s1977_s27 + $0x318] sm:$0xff]  ;;  %v349_v30 = vld [vmem:[%s1977_s27 + $0x150] sm:$0xff]  ;;  %v328_v32 = vld [vmem:[%s1977_s27 + $0xa8] sm:$0xff] }
  0x1f   : > { %v571_v27 = vadd.f32 %v570_v23, %v316_v21  ;;  %v385_v21 = vld [vmem:[%s1977_s27 + $0x270] sm:$0xff]  ;;  %v663_v23 = vadd.f32 %v662_v15, %v405_v11  ;;  %v387_v37 = vld [vmem:[%s1977_s27 + $0x280] sm:$0xff]  ;;  %v350_v38 = vld [vmem:[%s1977_s27 + $0x158] sm:$0xff] }
  0x20   : > { %v636_v53 = vadd.f32 %v635_v47, %v379_v44  ;;  %v601_v8 = vadd.f32 %v600_v2, %v345_v63  ;;  %v329_v40 = vld [vmem:[%s1977_s27 + $0xb0] sm:$0xff]  ;;  %v330_v44 = vld [vmem:[%s1977_s27 + $0xb8] sm:$0xff]  ;;  %v351_v47 = vld [vmem:[%s1977_s27 + $0x160] sm:$0xff] }
  0x21   : > { %v572_v31 = vadd.f32 %v571_v27, %v317_v25  ;;  %v407_v27 = vld [vmem:[%s1977_s27 + $0x320] sm:$0xff]  ;;  %v436_v57 = vld [vmem:[%s1977_s27 + $0x408] sm:$0xff]  ;;  %v353_v2 = vld [vmem:[%s1977_s27 + $0x170] sm:$0xff] }
  0x22   : > { %v637_v59 = vadd.f32 %v636_v53, %v380_v50  ;;  %v602_v18 = vadd.f32 %v601_v8, %v346_v6  ;;  %v435_v53 = vld [vmem:[%s1977_s27 + $0x400] sm:$0xff]  ;;  %v412_v8 = vld [vmem:[%s1977_s27 + $0x348] sm:$0xff]  ;;  %v333_v15 = vld [vmem:[%s1977_s27 + $0xd0] sm:$0xff] }
  0x23   : > { %v573_v35 = vadd.f32 %v572_v31, %v318_v29  ;;  %v386_v29 = vld [vmem:[%s1977_s27 + $0x278] sm:$0xff]  ;;  %v664_v31 = vadd.f32 %v663_v23, %v406_v19  ;;  %v695_v63 = vadd.f32 %v436_v57, %v435_v53  ;;  %v391_v11 = vld [vmem:[%s1977_s27 + $0x2a0] sm:$0xff]  ;;  %v469_v53 = vld [vmem:[%s1977_s27 + $0x510] sm:$0xff] }
  0x24   : > { %v638_v1 = vadd.f32 %v637_v59, %v381_v56  ;;  %v603_v26 = vadd.f32 %v602_v18, %v347_v14  ;;  %v331_v59 = vld [vmem:[%s1977_s27 + $0xc0] sm:$0xff]  ;;  %v413_v18 = vld [vmem:[%s1977_s27 + $0x350] sm:$0xff] }
  0x25   : > { %v574_v43 = vadd.f32 %v573_v35, %v319_v33  ;;  %v408_v35 = vld [vmem:[%s1977_s27 + $0x328] sm:$0xff]  ;;  %v439_v14 = vld [vmem:[%s1977_s27 + $0x420] sm:$0xff] }
  0x26   : > { %v639_v7 = vadd.f32 %v638_v1, %v382_v62  ;;  %v604_v34 = vadd.f32 %v603_v26, %v348_v22  ;;  %v411_v62 = vld [vmem:[%s1977_s27 + $0x340] sm:$0xff]  ;;  %v390_v1 = vld [vmem:[%s1977_s27 + $0x298] sm:$0xff] }
  0x27   : > { %v575_v49 = vadd.f32 %v574_v43, %v320_v39  ;;  %v665_v39 = vadd.f32 %v664_v31, %v407_v27  ;;  %v409_v43 = vld [vmem:[%s1977_s27 + $0x330] sm:$0xff]  ;;  %v355_v22 = vld [vmem:[%s1977_s27 + $0x180] sm:$0xff] }
  0x28   : > { %v640_v17 = vadd.f32 %v639_v7, %v383_v5  ;;  %v605_v42 = vadd.f32 %v604_v34, %v349_v30  ;;  %v332_v5 = vld [vmem:[%s1977_s27 + $0xc8] sm:$0xff]  ;;  %v335_v26 = vld [vmem:[%s1977_s27 + $0xe0] sm:$0xff] }
  0x29   : > { %v576_v55 = vadd.f32 %v575_v49, %v321_v46  ;;  %v388_v46 = vld [vmem:[%s1977_s27 + $0x288] sm:$0xff]  ;;  %v666_v48 = vadd.f32 %v665_v39, %v408_v35  ;;  %v389_v49 = vld [vmem:[%s1977_s27 + $0x290] sm:$0xff] }
  0x2a   : > { %v641_v25 = vadd.f32 %v640_v17, %v384_v13  ;;  %v606_v51 = vadd.f32 %v605_v42, %v350_v38  ;;  %v441_v35 = vld [vmem:[%s1977_s27 + $0x430] sm:$0xff] }
  0x2b   : > { %v577_v61 = vadd.f32 %v576_v55, %v322_v52  ;;  %v410_v52 = vld [vmem:[%s1977_s27 + $0x338] sm:$0xff]  ;;  %v352_v55 = vld [vmem:[%s1977_s27 + $0x168] sm:$0xff]  ;;  %v667_v56 = vadd.f32 %v666_v48, %v409_v43  ;;  %v357_v39 = vld [vmem:[%s1977_s27 + $0x190] sm:$0xff] }
  0x2c   : > { %v642_v33 = vadd.f32 %v641_v25, %v385_v21  ;;  %v392_v21 = vld [vmem:[%s1977_s27 + $0x2a8] sm:$0xff]  ;;  %v334_v25 = vld [vmem:[%s1977_s27 + $0xd8] sm:$0xff]  ;;  %v395_v48 = vld [vmem:[%s1977_s27 + $0x2c0] sm:$0xff] }
  0x2d   : > { %v578_v4 = vadd.f32 %v577_v61, %v323_v58  ;;  %v437_v58 = vld [vmem:[%s1977_s27 + $0x410] sm:$0xff]  ;;  %v607_v61 = vadd.f32 %v606_v51, %v351_v47  ;;  %v468_v47 = vld [vmem:[%s1977_s27 + $0x508] sm:$0xff] }
  0x2e   : > { %v643_v41 = vadd.f32 %v642_v33, %v386_v29  ;;  %v696_v9 = vadd.f32 %v695_v63, %v437_v58  ;;  %v414_v29 = vld [vmem:[%s1977_s27 + $0x358] sm:$0xff]  ;;  %v356_v33 = vld [vmem:[%s1977_s27 + $0x188] sm:$0xff]  ;;  %v443_v58 = vld [vmem:[%s1977_s27 + $0x440] sm:$0xff] }
  0x2f   : > { %v579_v12 = vadd.f32 %v578_v4, %v324_v0  ;;  %v438_v4 = vld [vmem:[%s1977_s27 + $0x418] sm:$0xff]  ;;  %v608_v7 = vadd.f32 %v607_v61, %v352_v55  ;;  %v416_v51 = vld [vmem:[%s1977_s27 + $0x368] sm:$0xff] }
  0x30   : > { %v644_v50 = vadd.f32 %v643_v41, %v387_v37  ;;  %v697_v19 = vadd.f32 %v696_v9, %v438_v4  ;;  %v394_v37 = vld [vmem:[%s1977_s27 + $0x2b8] sm:$0xff]  ;;  %v415_v41 = vld [vmem:[%s1977_s27 + $0x360] sm:$0xff]  ;;  %v396_v61 = vld [vmem:[%s1977_s27 + $0x2c8] sm:$0xff] }
  0x31   : > { %v580_v20 = vadd.f32 %v579_v12, %v325_v3  ;;  %v668_v3 = vadd.f32 %v667_v56, %v410_v52  ;;  %v354_v12 = vld [vmem:[%s1977_s27 + $0x178] sm:$0xff]  ;;  %v609_v17 = vadd.f32 %v608_v7, %v353_v2  ;;  %v359_v4 = vld [vmem:[%s1977_s27 + $0x1a0] sm:$0xff]  ;;  %v397_v9 = vld [vmem:[%s1977_s27 + $0x2d0] sm:$0xff] }
  0x32   : > { %v645_v60 = vadd.f32 %v644_v50, %v388_v46  ;;  %v698_v30 = vadd.f32 %v697_v19, %v439_v14  ;;  %v467_v46 = vld [vmem:[%s1977_s27 + $0x500] sm:$0xff]  ;;  %v358_v56 = vld [vmem:[%s1977_s27 + $0x198] sm:$0xff]  ;;  %v472_v19 = vld [vmem:[%s1977_s27 + $0x528] sm:$0xff] }
  0x33   : > { %v581_v28 = vadd.f32 %v580_v20, %v326_v16  ;;  %v669_v13 = vadd.f32 %v668_v3, %v411_v62  ;;  %v471_v7 = vld [vmem:[%s1977_s27 + $0x520] sm:$0xff] }
  0x34   : > { %v646_v6 = vadd.f32 %v645_v60, %v389_v49  ;;  %v337_v60 = vld [vmem:[%s1977_s27 + $0xf0] sm:$0xff] }
  0x35   : > { %v582_v36 = vadd.f32 %v581_v28, %v327_v24  ;;  %v670_v23 = vadd.f32 %v669_v13, %v412_v8  ;;  %v440_v24 = vld [vmem:[%s1977_s27 + $0x428] sm:$0xff]  ;;  %v610_v28 = vadd.f32 %v609_v17, %v354_v12  ;;  %v338_v8 = vld [vmem:[%s1977_s27 + $0xf8] sm:$0xff] }
  0x36   : > { %v647_v16 = vadd.f32 %v646_v6, %v390_v1  ;;  %v699_v42 = vadd.f32 %v698_v30, %v440_v24  ;;  %v444_v6 = vld [vmem:[%s1977_s27 + $0x448] sm:$0xff]  ;;  %v418_v12 = vld [vmem:[%s1977_s27 + $0x378] sm:$0xff]  ;;  %v473_v30 = vld [vmem:[%s1977_s27 + $0x530] sm:$0xff] }
  0x37   : > { %v583_v45 = vadd.f32 %v582_v36, %v328_v32  ;;  %v393_v32 = vld [vmem:[%s1977_s27 + $0x2b0] sm:$0xff]  ;;  %v671_v34 = vadd.f32 %v670_v23, %v413_v18  ;;  %v336_v36 = vld [vmem:[%s1977_s27 + $0xe8] sm:$0xff]  ;;  %v419_v23 = vld [vmem:[%s1977_s27 + $0x380] sm:$0xff] }
  0x38   : > { %v648_v27 = vadd.f32 %v647_v16, %v391_v11  ;;  %v700_v52 = vadd.f32 %v699_v42, %v441_v35  ;;  %v360_v16 = vld [vmem:[%s1977_s27 + $0x1a8] sm:$0xff]  ;;  %v445_v18 = vld [vmem:[%s1977_s27 + $0x450] sm:$0xff]  ;;  %v474_v42 = vld [vmem:[%s1977_s27 + $0x538] sm:$0xff] }
  0x39   : > { %v584_v54 = vadd.f32 %v583_v45, %v329_v40  ;;  %v611_v40 = vadd.f32 %v610_v28, %v355_v22  ;;  %v442_v45 = vld [vmem:[%s1977_s27 + $0x438] sm:$0xff]  ;;  %v420_v35 = vld [vmem:[%s1977_s27 + $0x388] sm:$0xff] }
  0x3a   : > { %v649_v38 = vadd.f32 %v648_v27, %v392_v21  ;;  %v701_v1 = vadd.f32 %v700_v52, %v442_v45  ;;  %v361_v27 = vld [vmem:[%s1977_s27 + $0x1b0] sm:$0xff]  ;;  %v448_v52 = vld [vmem:[%s1977_s27 + $0x468] sm:$0xff] }
  0x3b   : > { %v585_v0 = vadd.f32 %v584_v54, %v330_v44  ;;  %v672_v44 = vadd.f32 %v671_v34, %v414_v29  ;;  %v612_v50 = vadd.f32 %v611_v40, %v356_v33  ;;  %v728_v54 = vadd.f32 %v468_v47, %v467_v46  ;;  %v446_v29 = vld [vmem:[%s1977_s27 + $0x458] sm:$0xff]  ;;  %v499_v47 = vld [vmem:[%s1977_s27 + $0x600] sm:$0xff] }
  0x3c   : > { %v650_v49 = vadd.f32 %v649_v38, %v393_v32  ;;  %v702_v13 = vadd.f32 %v701_v1, %v443_v58  ;;  %v2100_v33 = vld [vmem:[%s1977_s27 + $0x1b8] sm:$0xff]  ;;  %v400_v38 = vld [vmem:[%s1977_s27 + $0x2e8] sm:$0xff] }
  0x3d   : > { %v586_v10 = vadd.f32 %v585_v0, %v331_v59  ;;  %v673_v57 = vadd.f32 %v672_v44, %v415_v41  ;;  %v470_v59 = vld [vmem:[%s1977_s27 + $0x518] sm:$0xff]  ;;  %v613_v63 = vadd.f32 %v612_v50, %v357_v39  ;;  %v417_v0 = vld [vmem:[%s1977_s27 + $0x370] sm:$0xff]  ;;  %v729_v2 = vadd.f32 %v728_v54, %v469_v53  ;;  %v447_v41 = vld [vmem:[%s1977_s27 + $0x460] sm:$0xff] }
  0x3e   : > { %v651_v62 = vadd.f32 %v650_v49, %v394_v37  ;;  %v703_v24 = vadd.f32 %v702_v13, %v444_v6  ;;  %v421_v39 = vld [vmem:[%s1977_s27 + $0x390] sm:$0xff]  ;;  %v2111_v50 = vld [vmem:[%s1977_s27 + $0x1c0] sm:$0xff]  ;;  %v422_v58 = vld [vmem:[%s1977_s27 + $0x398] sm:$0xff] }
  0x3f   : > { %v587_v20 = vadd.f32 %v586_v10, %v332_v5  ;;  %v674_v5 = vadd.f32 %v673_v57, %v416_v51  ;;  %v614_v11 = vadd.f32 %v613_v63, %v358_v56  ;;  %v730_v14 = vadd.f32 %v729_v2, %v470_v59  ;;  %v501_v49 = vld [vmem:[%s1977_s27 + $0x610] sm:$0xff]  ;;  %v475_v53 = vld [vmem:[%s1977_s27 + $0x540] sm:$0xff]  ;;  %v476_v1 = vld [vmem:[%s1977_s27 + $0x548] sm:$0xff] }
  0x40   : > { %v652_v10 = vadd.f32 %v651_v62, %v395_v48  ;;  %v500_v48 = vld [vmem:[%s1977_s27 + $0x608] sm:$0xff]  ;;  %v423_v6 = vld [vmem:[%s1977_s27 + $0x3a0] sm:$0xff]  ;;  %v477_v13 = vld [vmem:[%s1977_s27 + $0x550] sm:$0xff] }
  0x41   : > { %v588_v31 = vadd.f32 %v587_v20, %v333_v15  ;;  %v675_v17 = vadd.f32 %v674_v5, %v417_v0  ;;  %v398_v20 = vld [vmem:[%s1977_s27 + $0x2d8] sm:$0xff]  ;;  %v615_v22 = vadd.f32 %v614_v11, %v359_v4  ;;  %v761_v54 = vadd.f32 %v500_v48, %v499_v47  ;;  %v2120_v62 = vld [vmem:[%s1977_s27 + $0x1c8] sm:$0xff]  ;;  %v449_v0 = vld [vmem:[%s1977_s27 + $0x470] sm:$0xff] }
  0x42   : > { %v653_v21 = vadd.f32 %v652_v10, %v396_v61  ;;  %v502_v61 = vld [vmem:[%s1977_s27 + $0x618] sm:$0xff]  ;;  %v2129_v10 = vld [vmem:[%s1977_s27 + $0x1d0] sm:$0xff]  ;;  %v480_v47 = vld [vmem:[%s1977_s27 + $0x568] sm:$0xff] }
  0x43   : > { %v589_v43 = vadd.f32 %v588_v31, %v334_v25  ;;  %v731_v25 = vadd.f32 %v730_v14, %v471_v7  ;;  %v676_v28 = vadd.f32 %v675_v17, %v418_v12  ;;  %v399_v31 = vld [vmem:[%s1977_s27 + $0x2e0] sm:$0xff]  ;;  %v616_v34 = vadd.f32 %v615_v22, %v360_v16  ;;  %v450_v12 = vld [vmem:[%s1977_s27 + $0x478] sm:$0xff]  ;;  %v424_v17 = vld [vmem:[%s1977_s27 + $0x3a8] sm:$0xff] }
  0x44   : > { %v654_v32 = vadd.f32 %v653_v21, %v397_v9  ;;  %v762_v2 = vadd.f32 %v761_v54, %v501_v49  ;;  %v503_v9 = vld [vmem:[%s1977_s27 + $0x620] sm:$0xff]  ;;  %v2137_v21 = vld [vmem:[%s1977_s27 + $0x1d8] sm:$0xff]  ;;  %v532_v49 = vld [vmem:[%s1977_s27 + $0x708] sm:$0xff] }
  0x45   : > { %v590_v55 = vadd.f32 %v589_v43, %v335_v26  ;;  %v732_v37 = vadd.f32 %v731_v25, %v472_v19  ;;  %v677_v40 = vadd.f32 %v676_v28, %v419_v23  ;;  %v617_v44 = vadd.f32 %v616_v34, %v361_v27  ;;  %v451_v23 = vld [vmem:[%s1977_s27 + $0x480] sm:$0xff]  ;;  %v2148_v34 = vld [vmem:[%s1977_s27 + $0x1e8] sm:$0xff] }
  0x46   : > { %v655_v43 = vadd.f32 %v654_v32, %v398_v20  ;;  %v763_v14 = vadd.f32 %v762_v2, %v502_v61  ;;  %v504_v20 = vld [vmem:[%s1977_s27 + $0x628] sm:$0xff]  ;;  %v2142_v27 = vld [vmem:[%s1977_s27 + $0x1e0] sm:$0xff]  ;;  %v505_v32 = vld [vmem:[%s1977_s27 + $0x630] sm:$0xff] }
  0x47   : > { %v591_v3 = vadd.f32 %v590_v55, %v336_v36  ;;  %v704_v36 = vadd.f32 %v703_v24, %v445_v18  ;;  %v733_v46 = vadd.f32 %v732_v37, %v473_v30  ;;  %v678_v51 = vadd.f32 %v677_v40, %v420_v35  ;;  %v401_v55 = vld [vmem:[%s1977_s27 + $0x2f0] sm:$0xff]  ;;  %v478_v24 = vld [vmem:[%s1977_s27 + $0x558] sm:$0xff]  ;;  %v452_v37 = vld [vmem:[%s1977_s27 + $0x488] sm:$0xff] }
  0x48   : > { %v656_v56 = vadd.f32 %v655_v43, %v399_v31  ;;  %v618_v57 = vadd.f32 %v617_v44, %v2100_v33  ;;  %v764_v25 = vadd.f32 %v763_v14, %v503_v9  ;;  %v426_v35 = vld [vmem:[%s1977_s27 + $0x3b8] sm:$0xff]  ;;  %v427_v54 = vld [vmem:[%s1977_s27 + $0x3c0] sm:$0xff]  ;;  %v481_v61 = vld [vmem:[%s1977_s27 + $0x570] sm:$0xff] }
  0x49   : > { %v592_v15 = vadd.f32 %v591_v3, %v337_v60  ;;  %v705_v45 = vadd.f32 %v704_v36, %v446_v29  ;;  %v734_v60 = vadd.f32 %v733_v46, %v474_v42  ;;  %v679_v63 = vadd.f32 %v678_v51, %v421_v39  ;;  %v402_v3 = vld [vmem:[%s1977_s27 + $0x2f8] sm:$0xff]  ;;  %v425_v29 = vld [vmem:[%s1977_s27 + $0x3b0] sm:$0xff]  ;;  %v455_v9 = vld [vmem:[%s1977_s27 + $0x4a0] sm:$0xff] }
  0x4a   : > { %v657_v4 = vadd.f32 %v656_v56, %v400_v38  ;;  %v619_v5 = vadd.f32 %v618_v57, %v2111_v50  ;;  %v479_v38 = vld [vmem:[%s1977_s27 + $0x560] sm:$0xff]  ;;  %v765_v39 = vadd.f32 %v764_v25, %v504_v20  ;;  %v506_v44 = vld [vmem:[%s1977_s27 + $0x638] sm:$0xff]  ;;  %v533_v51 = vld [vmem:[%s1977_s27 + $0x710] sm:$0xff] }
  0x4b   : > { %v593_v26 = vadd.f32 %v592_v15, %v338_v8  ;;  %v706_v59 = vadd.f32 %v705_v45, %v447_v41  ;;  %v735_v8 = vadd.f32 %v734_v60, %v475_v53  ;;  %v680_v11 = vadd.f32 %v679_v63, %v422_v58  ;;  %v453_v41 = vld [vmem:[%s1977_s27 + $0x490] sm:$0xff]  ;;  %v531_v45 = vld [vmem:[%s1977_s27 + $0x700] sm:$0xff]  ;;  %v454_v60 = vld [vmem:[%s1977_s27 + $0x498] sm:$0xff] }
  0x4c   : > { %v658_v15 = vadd.f32 %v657_v4, %v401_v55  ;;  %v620_v16 = vadd.f32 %v619_v5, %v2120_v62  ;;  %v766_v48 = vadd.f32 %v765_v39, %v505_v32  ;;  %v507_v57 = vld [vmem:[%s1977_s27 + $0x640] sm:$0xff]  ;;  %v794_v58 = vadd.f32 %v532_v49, %v531_v45  ;;  %v536_v25 = vld [vmem:[%s1977_s27 + $0x728] sm:$0xff]  ;;  %v537_v39 = vld [vmem:[%s1977_s27 + $0x730] sm:$0xff] }
  0x4d   : > { %594 = vadd.xlane.f32.xlu0 %v593_v26  ;;  %v707_v7 = vadd.f32 %v706_v59, %v448_v52  ;;  %v736_v19 = vadd.f32 %v735_v8, %v476_v1  ;;  %v681_v22 = vadd.f32 %v680_v11, %v423_v6  ;;  %v2161_v52 = vld [vmem:[%s1977_s27 + $0x1f0] sm:$0xff]  ;;  %v2170_v1 = vld [vmem:[%s1977_s27 + $0x1f8] sm:$0xff]  ;;  %v508_v6 = vld [vmem:[%s1977_s27 + $0x648] sm:$0xff] }
  0x4e   : > { %v659_v26 = vadd.f32 %v658_v15, %v402_v3  ;;  %v621_v28 = vadd.f32 %v620_v16, %v2129_v10  ;;  %v767_v63 = vadd.f32 %v766_v48, %v506_v44  ;;  %v428_v3 = vld [vmem:[%s1977_s27 + $0x3c8] sm:$0xff]  ;;  %v482_v11 = vld [vmem:[%s1977_s27 + $0x578] sm:$0xff]  ;;  %v429_v15 = vld [vmem:[%s1977_s27 + $0x3d0] sm:$0xff] }
  0x4f   : > { %v708_v18 = vadd.f32 %v707_v7, %v449_v0  ;;  %v737_v31 = vadd.f32 %v736_v19, %v477_v13  ;;  %v682_v36 = vadd.f32 %v681_v22, %v424_v17  ;;  %v534_v0 = vld [vmem:[%s1977_s27 + $0x718] sm:$0xff]  ;;  %v795_v7 = vadd.f32 %v794_v58, %v533_v51  ;;  %v535_v13 = vld [vmem:[%s1977_s27 + $0x720] sm:$0xff]  ;;  %v456_v22 = vld [vmem:[%s1977_s27 + $0x4a8] sm:$0xff] }
  0x50   : > { %660 = vadd.xlane.f32.xlu1 %v659_v26  ;;  %v622_v40 = vadd.f32 %v621_v28, %v2137_v21  ;;  %v430_v28 = vld [vmem:[%s1977_s27 + $0x3d8] sm:$0xff]  ;;  %v432_v51 = vld [vmem:[%s1977_s27 + $0x3e8] sm:$0xff]  ;;  %v459_v58 = vld [vmem:[%s1977_s27 + $0x4c0] sm:$0xff] }
  0x51   : > { %v709_v30 = vadd.f32 %v708_v18, %v450_v12  ;;  %v738_v43 = vadd.f32 %v737_v31, %v478_v24  ;;  %v683_v46 = vadd.f32 %v682_v36, %v425_v29  ;;  %v768_v12 = vadd.f32 %v767_v63, %v507_v57  ;;  %v509_v18 = vld [vmem:[%s1977_s27 + $0x650] sm:$0xff]  ;;  %v510_v31 = vld [vmem:[%s1977_s27 + $0x658] sm:$0xff] }
  0x52   : > { %v623_v53 = vadd.f32 %v622_v40, %v2142_v27  ;;  %v796_v19 = vadd.f32 %v795_v7, %v534_v0  ;;  %v457_v36 = vld [vmem:[%s1977_s27 + $0x4b0] sm:$0xff]  ;;  %v431_v40 = vld [vmem:[%s1977_s27 + $0x3e0] sm:$0xff]  ;;  %v538_v49 = vld [vmem:[%s1977_s27 + $0x738] sm:$0xff] }
  0x53   : > { %v710_v42 = vadd.f32 %v709_v30, %v451_v23  ;;  %v739_v56 = vadd.f32 %v738_v43, %v479_v38  ;;  %v684_v59 = vadd.f32 %v683_v46, %v426_v35  ;;  %v483_v23 = vld [vmem:[%s1977_s27 + $0x580] sm:$0xff]  ;;  %v769_v24 = vadd.f32 %v768_v12, %v508_v6  ;;  %v458_v46 = vld [vmem:[%s1977_s27 + $0x4b8] sm:$0xff]  ;;  %v433_v63 = vld [vmem:[%s1977_s27 + $0x3f0] sm:$0xff] }
  0x54   : > { %v624_v2 = vadd.f32 %v623_v53, %v2148_v34  ;;  %v797_v32 = vadd.f32 %v796_v19, %v535_v13  ;;  %v511_v43 = vld [vmem:[%s1977_s27 + $0x660] sm:$0xff]  ;;  %v460_v6 = vld [vmem:[%s1977_s27 + $0x4c8] sm:$0xff] }
  0x55   : > { %v711_v55 = vadd.f32 %v710_v42, %v452_v37  ;;  %v740_v5 = vadd.f32 %v739_v56, %v480_v47  ;;  %v685_v8 = vadd.f32 %v684_v59, %v427_v54  ;;  %v484_v37 = vld [vmem:[%s1977_s27 + $0x588] sm:$0xff]  ;;  %v770_v38 = vadd.f32 %v769_v24, %v509_v18  ;;  %v485_v47 = vld [vmem:[%s1977_s27 + $0x590] sm:$0xff]  ;;  %v486_v59 = vld [vmem:[%s1977_s27 + $0x598] sm:$0xff] }
  0x56   : > { %v625_v14 = vadd.f32 %v624_v2, %v2161_v52  ;;  %v798_v44 = vadd.f32 %v797_v32, %v536_v25  ;;  %v487_v7 = vld [vmem:[%s1977_s27 + $0x5a0] sm:$0xff]  ;;  %v488_v18 = vld [vmem:[%s1977_s27 + $0x5a8] sm:$0xff] }
  0x57   : > { %v712_v4 = vadd.f32 %v711_v55, %v453_v41  ;;  %v741_v17 = vadd.f32 %v740_v5, %v481_v61  ;;  %v686_v20 = vadd.f32 %v685_v8, %v428_v3  ;;  %v771_v48 = vadd.f32 %v770_v38, %v510_v31  ;;  %v512_v55 = vld [vmem:[%s1977_s27 + $0x668] sm:$0xff]  ;;  %v539_v61 = vld [vmem:[%s1977_s27 + $0x740] sm:$0xff]  ;;  %v513_v3 = vld [vmem:[%s1977_s27 + $0x670] sm:$0xff] }
  0x58   : > { %v626_v26 = vadd.f32 %v625_v14, %v2170_v1  ;;  %v799_v56 = vadd.f32 %v798_v44, %v537_v39  ;;  %v514_v14 = vld [vmem:[%s1977_s27 + $0x678] sm:$0xff]  ;;  %v515_v24 = vld [vmem:[%s1977_s27 + $0x680] sm:$0xff]  ;;  %v517_v44 = vld [vmem:[%s1977_s27 + $0x690] sm:$0xff] }
  0x59   : > { %v713_v16 = vadd.f32 %v712_v4, %v454_v60  ;;  %v742_v30 = vadd.f32 %v741_v17, %v482_v11  ;;  %v687_v35 = vadd.f32 %v686_v20, %v429_v15  ;;  %v772_v60 = vadd.f32 %v771_v48, %v511_v43  ;;  %v434_v11 = vld [vmem:[%s1977_s27 + $0x3f8] sm:$0xff]  ;;  %v461_v17 = vld [vmem:[%s1977_s27 + $0x4d0] sm:$0xff]  ;;  %v463_v38 = vld [vmem:[%s1977_s27 + $0x4e0] sm:$0xff] }
  0x5a   : > { %627 = vadd.xlane.f32.xlu0 %v626_v26  ;;  %v800_v4 = vadd.f32 %v799_v56, %v538_v49  ;;  %v541_v20 = vld [vmem:[%s1977_s27 + $0x750] sm:$0xff]  ;;  %v542_v31 = vld [vmem:[%s1977_s27 + $0x758] sm:$0xff]  ;;  %v544_v49 = vld [vmem:[%s1977_s27 + $0x768] sm:$0xff] }
  0x5b   : > { %v714_v29 = vadd.f32 %v713_v16, %v455_v9  ;;  %v743_v42 = vadd.f32 %v742_v30, %v483_v23  ;;  %v688_v45 = vadd.f32 %v687_v35, %v430_v28  ;;  %v773_v8 = vadd.f32 %v772_v60, %v512_v55  ;;  %v540_v9 = vld [vmem:[%s1977_s27 + $0x748] sm:$0xff]  ;;  %v462_v28 = vld [vmem:[%s1977_s27 + $0x4d8] sm:$0xff]  ;;  %v465_v56 = vld [vmem:[%s1977_s27 + $0x4f0] sm:$0xff] }
  0x5c   : > { %v801_v15 = vadd.f32 %v800_v4, %v539_v61  ;;  %v490_v39 = vld [vmem:[%s1977_s27 + $0x5b8] sm:$0xff] }
  0x5d   : > { %v715_v41 = vadd.f32 %v714_v29, %v456_v22  ;;  %v744_v54 = vadd.f32 %v743_v42, %v484_v37  ;;  %v689_v57 = vadd.f32 %v688_v45, %v431_v40  ;;  %v774_v19 = vadd.f32 %v773_v8, %v513_v3  ;;  %v489_v29 = vld [vmem:[%s1977_s27 + $0x5b0] sm:$0xff]  ;;  %v520_v8 = vld [vmem:[%s1977_s27 + $0x6a8] sm:$0xff] }
  0x5e   : > { %v802_v25 = vadd.f32 %v801_v15, %v540_v9  ;;  %v493_v3 = vld [vmem:[%s1977_s27 + $0x5d0] sm:$0xff] }
  0x5f   : > { %v716_v53 = vadd.f32 %v715_v41, %v457_v36  ;;  %v745_v2 = vadd.f32 %v744_v54, %v485_v47  ;;  %v690_v5 = vadd.f32 %v689_v57, %v432_v51  ;;  %v775_v30 = vadd.f32 %v774_v19, %v514_v14  ;;  %v516_v36 = vld [vmem:[%s1977_s27 + $0x688] sm:$0xff]  ;;  %v543_v41 = vld [vmem:[%s1977_s27 + $0x760] sm:$0xff]  ;;  %v518_v54 = vld [vmem:[%s1977_s27 + $0x698] sm:$0xff] }
  0x60   : > { %v803_v37 = vadd.f32 %v802_v25, %v541_v20  ;;  %v491_v47 = vld [vmem:[%s1977_s27 + $0x5c0] sm:$0xff]  ;;  %v492_v57 = vld [vmem:[%s1977_s27 + $0x5c8] sm:$0xff] }
  0x61   : > { %v717_v0 = vadd.f32 %v716_v53, %v458_v46  ;;  %v746_v13 = vadd.f32 %v745_v2, %v486_v59  ;;  %v691_v16 = vadd.f32 %v690_v5, %v433_v63  ;;  %v776_v40 = vadd.f32 %v775_v30, %v515_v24  ;;  %v464_v46 = vld [vmem:[%s1977_s27 + $0x4e8] sm:$0xff]  ;;  %v545_v59 = vld [vmem:[%s1977_s27 + $0x770] sm:$0xff]  ;;  %v519_v63 = vld [vmem:[%s1977_s27 + $0x6a0] sm:$0xff] }
  0x62   : > { %v804_v45 = vadd.f32 %v803_v37, %v542_v31  ;;  %v466_v2 = vld [vmem:[%s1977_s27 + $0x4f8] sm:$0xff]  ;;  %v548_v20 = vld [vmem:[%s1977_s27 + $0x788] sm:$0xff]  ;;  %v523_v30 = vld [vmem:[%s1977_s27 + $0x6c0] sm:$0xff] }
  0x63   : > { %v718_v12 = vadd.f32 %v717_v0, %v459_v58  ;;  %v747_v23 = vadd.f32 %v746_v13, %v487_v7  ;;  %v692_v26 = vadd.f32 %v691_v16, %v434_v11  ;;  %v777_v48 = vadd.f32 %v776_v40, %v516_v36  ;;  %v546_v5 = vld [vmem:[%s1977_s27 + $0x778] sm:$0xff]  ;;  %v547_v13 = vld [vmem:[%s1977_s27 + $0x780] sm:$0xff]  ;;  %v521_v16 = vld [vmem:[%s1977_s27 + $0x6b0] sm:$0xff] }
  0x64   : > { %v805_v55 = vadd.f32 %v804_v45, %v543_v41  ;;  %v494_v11 = vld [vmem:[%s1977_s27 + $0x5d8] sm:$0xff]  ;;  %v496_v25 = vld [vmem:[%s1977_s27 + $0x5e8] sm:$0xff] }
  0x65   : > { %v719_v22 = vadd.f32 %v718_v12, %v460_v6  ;;  %v748_v35 = vadd.f32 %v747_v23, %v488_v18  ;;  %693 = vadd.xlane.f32.xlu1 %v692_v26  ;;  %v778_v58 = vadd.f32 %v777_v48, %v517_v44  ;;  %v495_v18 = vld [vmem:[%s1977_s27 + $0x5e0] sm:$0xff]  ;;  %v522_v23 = vld [vmem:[%s1977_s27 + $0x6b8] sm:$0xff]  ;;  %v525_v44 = vld [vmem:[%s1977_s27 + $0x6d0] sm:$0xff] }
  0x66   : > { %v806_v0 = vadd.f32 %v805_v55, %v544_v49  ;;  %v550_v36 = vld [vmem:[%s1977_s27 + $0x798] sm:$0xff]  ;;  %v527_v55 = vld [vmem:[%s1977_s27 + $0x6e0] sm:$0xff] }
  0x67   : > { %v720_v32 = vadd.f32 %v719_v22, %v461_v17  ;;  %v749_v43 = vadd.f32 %v748_v35, %v489_v29  ;;  %v779_v4 = vadd.f32 %v778_v58, %v518_v54  ;;  %v498_v40 = vld [vmem:[%s1977_s27 + $0x5f8] sm:$0xff]  ;;  %v553_v54 = vld [vmem:[%s1977_s27 + $0x7b0] sm:$0xff] }
  0x68   : > { %v807_v9 = vadd.f32 %v806_v0, %v545_v59  ;;  %v526_v49 = vld [vmem:[%s1977_s27 + $0x6d8] sm:$0xff]  ;;  %v528_v59 = vld [vmem:[%s1977_s27 + $0x6e8] sm:$0xff]  ;;  %v529_v0 = vld [vmem:[%s1977_s27 + $0x6f0] sm:$0xff] }
  0x69   : > { %v721_v42 = vadd.f32 %v720_v32, %v462_v28  ;;  %v750_v53 = vadd.f32 %v749_v43, %v490_v39  ;;  %v780_v12 = vadd.f32 %v779_v4, %v519_v63  ;;  %v549_v28 = vld [vmem:[%s1977_s27 + $0x790] sm:$0xff]  ;;  %v554_v58 = vld [vmem:[%s1977_s27 + $0x7b8] sm:$0xff]  ;;  %v555_v63 = vld [vmem:[%s1977_s27 + $0x7c0] sm:$0xff] }
  0x6a   : > { %v808_v17 = vadd.f32 %v807_v9, %v546_v5  ;;  %v497_v32 = vld [vmem:[%s1977_s27 + $0x5f0] sm:$0xff]  ;;  %v556_v4 = vld [vmem:[%s1977_s27 + $0x7c8] sm:$0xff]  ;;  %v530_v5 = vld [vmem:[%s1977_s27 + $0x6f8] sm:$0xff] }
  0x6b   : > { %v722_v51 = vadd.f32 %v721_v42, %v463_v38  ;;  %v751_v61 = vadd.f32 %v750_v53, %v491_v47  ;;  %v781_v19 = vadd.f32 %v780_v12, %v520_v8  ;;  %v524_v38 = vld [vmem:[%s1977_s27 + $0x6c8] sm:$0xff]  ;;  %v551_v42 = vld [vmem:[%s1977_s27 + $0x7a0] sm:$0xff]  ;;  %v557_v8 = vld [vmem:[%s1977_s27 + $0x7d0] sm:$0xff] }
  0x6c   : > { %v809_v24 = vadd.f32 %v808_v17, %v547_v13  ;;  %v552_v47 = vld [vmem:[%s1977_s27 + $0x7a8] sm:$0xff]  ;;  %v558_v12 = vld [vmem:[%s1977_s27 + $0x7d8] sm:$0xff] }
  0x6d   : > { %v723_v60 = vadd.f32 %v722_v51, %v464_v46  ;;  %v752_v7 = vadd.f32 %v751_v61, %v492_v57  ;;  %v782_v26 = vadd.f32 %v781_v19, %v521_v16  ;;  %v560_v16 = vld [vmem:[%s1977_s27 + $0x7e8] sm:$0xff] }
  0x6e   : > { %v810_v31 = vadd.f32 %v809_v24, %v548_v20  ;;  %v562_v20 = vld [vmem:[%s1977_s27 + $0x7f8] sm:$0xff] }
  0x6f   : > { %v724_v6 = vadd.f32 %v723_v60, %v465_v56  ;;  %v753_v15 = vadd.f32 %v752_v7, %v493_v3  ;;  %v783_v35 = vadd.f32 %v782_v26, %v522_v23 }
  0x70   : > { %v811_v39 = vadd.f32 %v810_v31, %v549_v28  ;;  %v835_v31 = vld [vmem:[%s3149_s2] sm:$0xff] }
  0x71   : > { %v725_v14 = vadd.f32 %v724_v6, %v466_v2  ;;  %v754_v22 = vadd.f32 %v753_v15, %v494_v11  ;;  %v784_v41 = vadd.f32 %v783_v35, %v523_v30 }
  0x72   : > { %v812_v45 = vadd.f32 %v811_v39, %v550_v36 }
  0x73   : > { %726 = vadd.xlane.f32.xlu0 %v725_v14  ;;  %v755_v29 = vadd.f32 %v754_v22, %v495_v18  ;;  %v785_v46 = vadd.f32 %v784_v41, %v524_v38  ;;  %v559_v14 = vld [vmem:[%s1977_s27 + $0x7e0] sm:$0xff]  ;;  %v561_v18 = vld [vmem:[%s1977_s27 + $0x7f0] sm:$0xff]  ;;  %v838_v41 = vld [vmem:[%s3149_s2 + $0x18] sm:$0xff] }
  0x74   : > { %v813_v51 = vadd.f32 %v812_v45, %v551_v42  ;;  %v837_v38 = vld [vmem:[%s3149_s2 + $0x10] sm:$0xff] }
  0x75   : > { %v756_v37 = vadd.f32 %v755_v29, %v496_v25  ;;  %v786_v53 = vadd.f32 %v785_v46, %v525_v44  ;;  %v836_v29 = vld [vmem:[%s3149_s2 + $0x8] sm:$0xff] }
  0x76   : > { %v814_v56 = vadd.f32 %v813_v51, %v552_v47 }
  0x77   : > { %v757_v43 = vadd.f32 %v756_v37, %v497_v32  ;;  %v787_v57 = vadd.f32 %v786_v53, %v526_v49 }
  0x78   : > { %v815_v60 = vadd.f32 %v814_v56, %v553_v54 }
  0x79   : > { %v758_v48 = vadd.f32 %v757_v43, %v498_v40  ;;  %v788_v61 = vadd.f32 %v787_v57, %v527_v55  ;;  %v840_v57 = vld [vmem:[%s3149_s2 + $0x28] sm:$0xff] }
  0x7a   : > { %v816_v2 = vadd.f32 %v815_v60, %v554_v58 }
  0x7b   : > { %759 = vadd.xlane.f32.xlu1 %v758_v48  ;;  %v789_v3 = vadd.f32 %v788_v61, %v528_v59  ;;  %v839_v48 = vld [vmem:[%s3149_s2 + $0x20] sm:$0xff] }
  0x7c   : > { %v817_v6 = vadd.f32 %v816_v2, %v555_v63 }
  0x7d   : > { %v790_v7 = vadd.f32 %v789_v3, %v529_v0  ;;  %v841_v0 = vld [vmem:[%s3149_s2 + $0x30] sm:$0xff] }
  0x7e   : > { %v818_v9 = vadd.f32 %v817_v6, %v556_v4 }
  0x7f   : > { %v791_v11 = vadd.f32 %v790_v7, %v530_v5  ;;  %v842_v7 = vld [vmem:[%s3149_s2 + $0x38] sm:$0xff] }
  0x80   : > { %v819_v13 = vadd.f32 %v818_v9, %v557_v8 }
  0x81   : > { %792 = vadd.xlane.f32.xlu0 %v791_v11 }
  0x82   : > { %v820_v15 = vadd.f32 %v819_v13, %v558_v12 }
  0x84   : > { %v821_v17 = vadd.f32 %v820_v15, %v559_v14 }
  0x86   : > { %v822_v19 = vadd.f32 %v821_v17, %v560_v16  ;;  %v884_v17 = vlaneseq }
  0x88   : > { %v823_v22 = vadd.f32 %v822_v19, %v561_v18 }
  0x8a   : > { %v824_v23 = vadd.f32 %v823_v22, %v562_v20  ;;  %v885_v20 = vshrl.u32 %v884_v17, 7 }
  0x8c   : > { %825 = vadd.xlane.f32.xlu1 %v824_v23  ;;  %v873_v23 = vld [vmem:[%s3150_s3] sm:$0x1] }
  0xd6   : > { %v595_v24 = vpop.xlane.xlu0 %594 }
  0xd7   : > { %v827_v30 = vmul.f32 0.00024414063, %v595_v24 }
  0xd9   : > { %v661_v26 = vpop.xlane.xlu1 %660  ;;  %v843_v36 = vmul.f32 %v835_v31, %v827_v30  ;;  %v876_v30 = vld [vmem:[%s3151_s4] sm:$0xff] }
  0xda   : > { %v829_v37 = vmul.f32 0.00024414063, %v661_v26 }
  0xdb   : > { %v852_v43 = vsel %vm851_vm0, %v843_v36, 0.0 }
  0xdc   : > { %v845_v44 = vmul.f32 %v837_v38, %v829_v37 }
  0xde   : > { %v855_v51 = vsel %vm851_vm0, %v845_v44, 0.0 }
  0xe3   : > { %v628_v25 = vpop.xlane.xlu0 %627 }
  0xe4   : > { %v828_v28 = vmul.f32 0.00024414063, %v628_v25  ;;  %v886_v25 = vsub.s32 0, %v885_v20 }
  0xe6   : > { %v844_v32 = vmul.f32 %v836_v29, %v828_v28  ;;  %v877_v29 = vld [vmem:[%s3151_s4 + $0x8] sm:$0xff] }
  0xe8   : > { %v853_v39 = vsel %vm851_vm0, %v844_v32, 0.0  ;;  %v879_v32 = vld [vmem:[%s3151_s4 + $0x18] sm:$0xff] }
  0xe9   : > { %v854_v45 = vadd.f32 %v853_v39, %v852_v43  ;;  %v880_v43 = vld [vmem:[%s3151_s4 + $0x20] sm:$0xff] }
  0xeb   : > { %v856_v53 = vadd.f32 %v855_v51, %v854_v45 }
  0xee   : > { %v694_v35 = vpop.xlane.xlu1 %693 }
  0xef   : > { %v830_v40 = vmul.f32 0.00024414063, %v694_v35  ;;  %v878_v35 = vld [vmem:[%s3151_s4 + $0x10] sm:$0xff] }
  0xf1   : > { %v846_v46 = vmul.f32 %v838_v41, %v830_v40 }
  0xf3   : > { %v857_v54 = vsel %vm851_vm0, %v846_v46, 0.0 }
  0xf4   : > { %v858_v59 = vadd.f32 %v857_v54, %v856_v53 }
  0xfc   : > { %v727_v42 = vpop.xlane.xlu0 %726 }
  0xfd   : > { %v831_v47 = vmul.f32 0.00024414063, %v727_v42  ;;  %v881_v42 = vld [vmem:[%s3151_s4 + $0x28] sm:$0xff] }
  0xff   : > { %v847_v55 = vmul.f32 %v839_v48, %v831_v47  ;;  %v883_v48 = vld [vmem:[%s3151_s4 + $0x38] sm:$0xff] }
 0x101   : > { %v859_v60 = vsel %vm851_vm0, %v847_v55, 0.0 }
 0x102   : > { %v860_v2 = vadd.f32 %v859_v60, %v858_v59  ;;  %v921_v59 = vld [vmem:[%s3152_s5 + $0x8] sm:$0xff]  ;;  %v920_v60 = vld [vmem:[%s3152_s5] sm:$0xff] }
 0x104   : > { %v760_v49 = vpop.xlane.xlu1 %759 }
 0x105   : > { %v832_v56 = vmul.f32 0.00024414063, %v760_v49  ;;  %v882_v49 = vld [vmem:[%s3151_s4 + $0x30] sm:$0xff] }
 0x107   : > { %v848_v61 = vmul.f32 %v840_v57, %v832_v56 }
 0x109   : > { %v861_v3 = vsel %vm851_vm0, %v848_v61, 0.0 }
 0x10a   : > { %v793_v58 = vpop.xlane.xlu0 %792  ;;  %v862_v5 = vadd.f32 %v861_v3, %v860_v2  ;;  %v923_v3 = vld [vmem:[%s3152_s5 + $0x18] sm:$0xff] }
 0x10b   : > { %v833_v63 = vmul.f32 0.00024414063, %v793_v58  ;;  %v1920_v58 = vmov 0  }
 0x10c   : > { %1632 = vset.pattern.permute.xlu1 %v1920_v58  ;;  %1631 = vset.pattern.permute.xlu0 %v1920_v58 }
 0x10d   : > { %v849_v4 = vmul.f32 %v841_v0, %v833_v63 }
 0x10f   : > { %v863_v6 = vsel %vm851_vm0, %v849_v4, 0.0  ;;  %v922_v4 = vld [vmem:[%s3152_s5 + $0x10] sm:$0xff] }
 0x110   : > { %v864_v11 = vadd.f32 %v863_v6, %v862_v5 }
 0x115   : > { %v826_v8 = vpop.xlane.xlu1 %825 }
 0x116   : > { %v834_v9 = vmul.f32 0.00024414063, %v826_v8 }
 0x118   : > { %v850_v12 = vmul.f32 %v842_v7, %v834_v9 }
 0x11a   : > { %v865_v13 = vsel %vm851_vm0, %v850_v12, 0.0 }
 0x11b   : > { %v866_v14 = vadd.f32 %v865_v13, %v864_v11 }
 0x11d   : > { %v867_v15 = vrot.slane %v866_v14, 4 }
 0x11f   : > { %v868_v16 = vadd.f32 %v867_v15, %v866_v14  ;;  %v925_v14 = vld [vmem:[%s3152_s5 + $0x28] sm:$0xff]  ;;  %v924_v15 = vld [vmem:[%s3152_s5 + $0x20] sm:$0xff] }
 0x121   : > { %v869_v18 = vrot.slane %v868_v16, 2 }
 0x123   : > { %v870_v19 = vadd.f32 %v869_v18, %v868_v16 }
 0x125   : > { %v871_v22 = vrot.slane %v870_v19, 1 }
 0x127   : > { %v872_v24 = vadd.f32 %v871_v22, %v870_v19 }
 0x129   : > { %v874_v26 = vadd.f32 %v873_v23, %v872_v24 }
 0x12b   : > { %v875_v28 = vmax.f32 %v874_v26, 0.0 }
 0x12d   : > { %v887_v31 = vrot.slane %v875_v28, %v886_v25  ;;  %v926_v25 = vld [vmem:[%s3152_s5 + $0x30] sm:$0xff] }
 0x12f   : > { %v889_v36 = vmul.f32 %v887_v31, %v877_v29  ;;  %v888_v37 = vmul.f32 %v887_v31, %v876_v30  ;;  %v891_v40 = vmul.f32 %v887_v31, %v879_v32  ;;  %v890_v41 = vmul.f32 %v887_v31, %v878_v35  ;;  %v927_v29 = vld [vmem:[%s3152_s5 + $0x38] sm:$0xff] }
 0x130   : > { %v893_v46 = vmul.f32 %v887_v31, %v881_v42  ;;  %v892_v47 = vmul.f32 %v887_v31, %v880_v43  ;;  %v895_v54 = vmul.f32 %v887_v31, %v883_v48  ;;  %v894_v55 = vmul.f32 %v887_v31, %v882_v49 }
 0x131   : > { %v899_v38 = vsel %vm851_vm0, %v889_v36, 0.0  ;;  %v896_v39 = vsel %vm851_vm0, %v888_v37, 0.0  ;;  %v905_v44 = vsel %vm851_vm0, %v891_v40, 0.0  ;;  %v902_v45 = vsel %vm851_vm0, %v890_v41, 0.0 }
 0x132   : > { %900 = vadd.xlane.f32.xlu1 %v899_v38  ;;  %897 = vadd.xlane.f32.xlu0 %v896_v39  ;;  %v911_v51 = vsel %vm851_vm0, %v893_v46, 0.0  ;;  %v908_v53 = vsel %vm851_vm0, %v892_v47, 0.0  ;;  %v917_v56 = vsel %vm851_vm0, %v895_v54, 0.0  ;;  %v914_v57 = vsel %vm851_vm0, %v894_v55, 0.0 }
 0x136   : > { %906 = vadd.xlane.f32.xlu1 %v905_v44  ;;  %903 = vadd.xlane.f32.xlu0 %v902_v45 }
 0x13a   : > { %912 = vadd.xlane.f32.xlu1 %v911_v51  ;;  %909 = vadd.xlane.f32.xlu0 %v908_v53 }
 0x13e   : > { %918 = vadd.xlane.f32.xlu1 %v917_v56  ;;  %915 = vadd.xlane.f32.xlu0 %v914_v57 }
 0x1bb   : > { %v901_v61 = vpop.xlane.xlu1 %900  ;;  %v898_v63 = vpop.xlane.xlu0 %897 }
 0x1bc   : > { %v929_v0 = vadd.f32 %v921_v59, %v901_v61  ;;  %v928_v2 = vadd.f32 %v920_v60, %v898_v63 }
 0x1be   : > { %v937_v5 = vsub.f32 0.0, %v929_v0  ;;  %v936_v6 = vsub.f32 0.0, %v928_v2 }
 0x1bf   : > { %v907_v7 = vpop.xlane.xlu1 %906  ;;  %v904_v8 = vpop.xlane.xlu0 %903 }
 0x1c0   : > { %v946_v9 = vmul.f32 1.442695, %v937_v5  ;;  %v944_v11 = vmul.f32 1.442695, %v936_v6  ;;  %v931_v12 = vadd.f32 %v923_v3, %v907_v7  ;;  %v930_v13 = vadd.f32 %v922_v4, %v904_v8  ;;  %v1665_v7 = vld [vmem:[%s1977_s27 + $0x100] sm:$0xff] }
 0x1c2   : > { %1633 = vpow2.f32 %v946_v9  ;;  %v939_v16 = vsub.f32 0.0, %v931_v12  ;;  %v938_v17 = vsub.f32 0.0, %v930_v13  ;;  %v1666_v9 = vld [vmem:[%s1977_s27 + $0x108] sm:$0xff]  ;;  %v1667_v12 = vld [vmem:[%s1977_s27 + $0x110] sm:$0xff] }
 0x1c3   : > { %1635 = vpow2.f32 %v944_v11  ;;  %v913_v18 = vpop.xlane.xlu1 %912  ;;  %v910_v19 = vpop.xlane.xlu0 %909 }
 0x1c4   : > { %v950_v20 = vmul.f32 1.442695, %v939_v16  ;;  %v948_v22 = vmul.f32 1.442695, %v938_v17  ;;  %v933_v23 = vadd.f32 %v925_v14, %v913_v18  ;;  %v932_v24 = vadd.f32 %v924_v15, %v910_v19  ;;  %v1668_v14 = vld [vmem:[%s1977_s27 + $0x118] sm:$0xff]  ;;  %v1669_v16 = vld [vmem:[%s1977_s27 + $0x120] sm:$0xff] }
 0x1c5   : > { %v1670_v18 = vld [vmem:[%s1977_s27 + $0x128] sm:$0xff] }
 0x1c6   : > { %1637 = vpow2.f32 %v950_v20  ;;  %v940_v26 = vsub.f32 0.0, %v932_v24  ;;  %v941_v28 = vsub.f32 0.0, %v933_v23  ;;  %v1671_v20 = vld [vmem:[%s1977_s27 + $0x130] sm:$0xff]  ;;  %v1672_v23 = vld [vmem:[%s1977_s27 + $0x138] sm:$0xff] }
 0x1c7   : > { %1639 = vpow2.f32 %v948_v22  ;;  %v919_v30 = vpop.xlane.xlu1 %918  ;;  %v916_v31 = vpop.xlane.xlu0 %915 }
 0x1c8   : > { %v952_v32 = vmul.f32 1.442695, %v940_v26  ;;  %v934_v35 = vadd.f32 %v926_v25, %v916_v31  ;;  %v935_v36 = vadd.f32 %v927_v29, %v919_v30  ;;  %v954_v38 = vmul.f32 1.442695, %v941_v28  ;;  %v1673_v25 = vld [vmem:[%s1977_s27 + $0x140] sm:$0xff]  ;;  %v1674_v28 = vld [vmem:[%s1977_s27 + $0x148] sm:$0xff] }
 0x1c9   : > { %v1675_v30 = vld [vmem:[%s1977_s27 + $0x150] sm:$0xff] }
 0x1ca   : > { %v942_v37 = vsub.f32 0.0, %v934_v35  ;;  %1641 = vpow2.f32 %v952_v32  ;;  %v943_v40 = vsub.f32 0.0, %v935_v36  ;;  %v1676_v32 = vld [vmem:[%s1977_s27 + $0x158] sm:$0xff]  ;;  %v1677_v36 = vld [vmem:[%s1977_s27 + $0x160] sm:$0xff] }
 0x1cb   : > { %1643 = vpow2.f32 %v954_v38  ;;  %v1678_v38 = vld [vmem:[%s1977_s27 + $0x168] sm:$0xff] }
 0x1cc   : > { %v956_v39 = vmul.f32 1.442695, %v942_v37  ;;  %v958_v45 = vmul.f32 1.442695, %v943_v40  ;;  %v1679_v40 = vld [vmem:[%s1977_s27 + $0x170] sm:$0xff] }
 0x1ce   : > { %1645 = vpow2.f32 %v956_v39 }
 0x1cf   : > { %v1634_v41 = vpop.eup %1633 }
 0x1d0   : > { %v1636_v42 = vpop.eup %1635  ;;  %v961_v43 = vadd.f32 1.0, %v1634_v41 }
 0x1d1   : > { %v960_v44 = vadd.f32 1.0, %v1636_v42  ;;  %v1680_v42 = vld [vmem:[%s1977_s27 + $0x178] sm:$0xff] }
 0x1d2   : > { %1647 = vrcp.f32 %v961_v43 }
 0x1d3   : > { %v1638_v46 = vpop.eup %1637  ;;  %1649 = vrcp.f32 %v960_v44  ;;  %v1681_v44 = vld [vmem:[%s1977_s27 + $0x180] sm:$0xff] }
 0x1d4   : > { %v1640_v47 = vpop.eup %1639  ;;  %1651 = vpow2.f32 %v958_v45  ;;  %v963_v49 = vadd.f32 1.0, %v1638_v46  ;;  %v1682_v46 = vld [vmem:[%s1977_s27 + $0x188] sm:$0xff] }
 0x1d5   : > { %v962_v48 = vadd.f32 1.0, %v1640_v47 }
 0x1d7   : > { %1653 = vrcp.f32 %v962_v48  ;;  %v1642_v51 = vpop.eup %1641  ;;  %v1683_v48 = vld [vmem:[%s1977_s27 + $0x190] sm:$0xff] }
 0x1d8   : > { %1655 = vrcp.f32 %v963_v49  ;;  %v964_v53 = vadd.f32 1.0, %v1642_v51  ;;  %v1644_v54 = vpop.eup %1643  ;;  %v1684_v51 = vld [vmem:[%s1977_s27 + $0x198] sm:$0xff] }
 0x1d9   : > { %v965_v57 = vadd.f32 1.0, %v1644_v54  ;;  %v1685_v54 = vld [vmem:[%s1977_s27 + $0x1a0] sm:$0xff] }
 0x1da   : > { %1657 = vrcp.f32 %v964_v53 }
 0x1db   : > { %v1646_v55 = vpop.eup %1645  ;;  %1659 = vrcp.f32 %v965_v57 }
 0x1dc   : > { %v966_v60 = vadd.f32 1.0, %v1646_v55 }
 0x1de   : > { %1661 = vrcp.f32 %v966_v60 }
 0x1df   : > { %v1648_v56 = vpop.eup %1647 }
 0x1e0   : > { %v1650_v58 = vpop.eup %1649  ;;  %991 = vperm.xlu1 %1632, %v1648_v56   ;;  %v1686_v56 = vld [vmem:[%s1977_s27 + $0x1a8] sm:$0xff] }
 0x1e1   : > { %986 = vperm.xlu0 %1631, %v1650_v58   ;;  %v1652_v59 = vpop.eup %1651  ;;  %v1687_v58 = vld [vmem:[%s1977_s27 + $0x1b0] sm:$0xff] }
 0x1e2   : > { %v967_v63 = vadd.f32 1.0, %v1652_v59 }
 0x1e4   : > { %v1654_v61 = vpop.eup %1653  ;;  %1663 = vrcp.f32 %v967_v63 }
 0x1e5   : > { %996 = vperm.xlu1 %1632, %v1654_v61   ;;  %v1656_v0 = vpop.eup %1655 }
 0x1e7   : > { %v1658_v2 = vpop.eup %1657 }
 0x1e8   : > { %v1660_v3 = vpop.eup %1659 }
 0x1e9   : > { %1001 = vperm.xlu1 %1632, %v1656_v0  }
 0x1eb   : > { %v1662_v4 = vpop.eup %1661 }
 0x1ed   : > { %1006 = vperm.xlu1 %1632, %v1658_v2  }
 0x1f1   : > { %1011 = vperm.xlu1 %1632, %v1660_v3   ;;  %v1664_v5 = vpop.eup %1663  ;;  %v1690_v3 = vld [vmem:[%s1977_s27 + $0x10] sm:$0xff] }
 0x1f5   : > { %1016 = vperm.xlu1 %1632, %v1662_v4  }
 0x1f9   : > { %1021 = vperm.xlu1 %1632, %v1664_v5   ;;  %v1691_v5 = vld [vmem:[%s1977_s27 + $0x18] sm:$0xff] }
 0x25b   : > { %v2360_v6 = vpop.permute.xlu1 %991 }
 0x25c   : > { %v1056_v8 = vmul.f32 %v1665_v7, %v2360_v6  ;;  %v1057_v11 = vmul.f32 %v1666_v9, %v2360_v6  ;;  %v1058_v13 = vmul.f32 %v1667_v12, %v2360_v6  ;;  %v1059_v15 = vmul.f32 %v1668_v14, %v2360_v6  ;;  %v2426_v61 = vpop.permute.xlu0 %986  ;;  %v1692_v7 = vld [vmem:[%s1977_s27 + $0x20] sm:$0xff]  ;;  %v1693_v9 = vld [vmem:[%s1977_s27 + $0x28] sm:$0xff]  ;;  %v1694_v12 = vld [vmem:[%s1977_s27 + $0x30] sm:$0xff] }
 0x25d   : > { %v1060_v17 = vmul.f32 %v1669_v16, %v2360_v6  ;;  %v1061_v19 = vmul.f32 %v1670_v18, %v2360_v6  ;;  %v1062_v22 = vmul.f32 %v1671_v20, %v2360_v6  ;;  %v1063_v24 = vmul.f32 %v1672_v23, %v2360_v6  ;;  %v1695_v14 = vld [vmem:[%s1977_s27 + $0x38] sm:$0xff]  ;;  %v1696_v16 = vld [vmem:[%s1977_s27 + $0x40] sm:$0xff]  ;;  %v1697_v18 = vld [vmem:[%s1977_s27 + $0x48] sm:$0xff] }
 0x25e   : > { %v1064_v26 = vmul.f32 %v1673_v25, %v2360_v6  ;;  %v1065_v29 = vmul.f32 %v1674_v28, %v2360_v6  ;;  %v1066_v31 = vmul.f32 %v1675_v30, %v2360_v6  ;;  %v1067_v35 = vmul.f32 %v1676_v32, %v2360_v6  ;;  %1312 = vst [vmem:[%s2358_s15 + $0x100] sm:$0xff] %v1056_v8  ;;  %v1698_v20 = vld [vmem:[%s1977_s27 + $0x50] sm:$0xff]  ;;  %v1699_v23 = vld [vmem:[%s1977_s27 + $0x58] sm:$0xff]  ;;  %v1700_v25 = vld [vmem:[%s1977_s27 + $0x60] sm:$0xff] }
 0x25f   : > { %1313 = vst [vmem:[%s2358_s15 + $0x108] sm:$0xff] %v1057_v11  ;;  %1314 = vst [vmem:[%s2358_s15 + $0x110] sm:$0xff] %v1058_v13  ;;  %v1068_v37 = vmul.f32 %v1677_v36, %v2360_v6  ;;  %v1069_v39 = vmul.f32 %v1678_v38, %v2360_v6  ;;  %v1070_v41 = vmul.f32 %v1679_v40, %v2360_v6  ;;  %v1701_v28 = vld [vmem:[%s1977_s27 + $0x68] sm:$0xff]  ;;  %v1702_v30 = vld [vmem:[%s1977_s27 + $0x70] sm:$0xff] }
 0x260   : > { %1315 = vst [vmem:[%s2358_s15 + $0x118] sm:$0xff] %v1059_v15  ;;  %v1071_v43 = vmul.f32 %v1680_v42, %v2360_v6  ;;  %1316 = vst [vmem:[%s2358_s15 + $0x120] sm:$0xff] %v1060_v17  ;;  %v1072_v45 = vmul.f32 %v1681_v44, %v2360_v6  ;;  %v1073_v47 = vmul.f32 %v1682_v46, %v2360_v6  ;;  %v1703_v32 = vld [vmem:[%s1977_s27 + $0x78] sm:$0xff]  ;;  %v1704_v36 = vld [vmem:[%s1977_s27 + $0x80] sm:$0xff] }
 0x261   : > { %1317 = vst [vmem:[%s2358_s15 + $0x128] sm:$0xff] %v1061_v19  ;;  %1318 = vst [vmem:[%s2358_s15 + $0x130] sm:$0xff] %v1062_v22  ;;  %v1074_v49 = vmul.f32 %v1683_v48, %v2360_v6  ;;  %v1075_v53 = vmul.f32 %v1684_v51, %v2360_v6  ;;  %v1076_v55 = vmul.f32 %v1685_v54, %v2360_v6  ;;  %v1705_v38 = vld [vmem:[%s1977_s27 + $0x88] sm:$0xff]  ;;  %v1706_v40 = vld [vmem:[%s1977_s27 + $0x90] sm:$0xff]  ;;  %v2524_v54 = vpop.permute.xlu1 %996 }
 0x262   : > { %1319 = vst [vmem:[%s2358_s15 + $0x138] sm:$0xff] %v1063_v24  ;;  %1320 = vst [vmem:[%s2358_s15 + $0x140] sm:$0xff] %v1064_v26  ;;  %v1077_v57 = vmul.f32 %v1686_v56, %v2360_v6  ;;  %v1078_v59 = vmul.f32 %v1687_v58, %v2360_v6  ;;  %v1079_v60 = vmul.f32 %v2360_v6, %v2100_v33  ;;  %v1707_v42 = vld [vmem:[%s1977_s27 + $0x98] sm:$0xff]  ;;  %v1708_v44 = vld [vmem:[%s1977_s27 + $0xa0] sm:$0xff] }
 0x263   : > { %1321 = vst [vmem:[%s2358_s15 + $0x148] sm:$0xff] %v1065_v29  ;;  %1322 = vst [vmem:[%s2358_s15 + $0x150] sm:$0xff] %v1066_v31  ;;  %v1080_v63 = vmul.f32 %v2360_v6, %v2111_v50  ;;  %v1081_v0 = vmul.f32 %v2360_v6, %v2120_v62  ;;  %v1082_v33 = vmul.f32 %v2360_v6, %v2129_v10  ;;  %v1709_v46 = vld [vmem:[%s1977_s27 + $0xa8] sm:$0xff]  ;;  %v1710_v48 = vld [vmem:[%s1977_s27 + $0xb0] sm:$0xff] }
 0x264   : > { %1323 = vst [vmem:[%s2358_s15 + $0x158] sm:$0xff] %v1067_v35  ;;  %1324 = vst [vmem:[%s2358_s15 + $0x160] sm:$0xff] %v1068_v37  ;;  %v1083_v2 = vmul.f32 %v2360_v6, %v2137_v21  ;;  %v1084_v50 = vmul.f32 %v2360_v6, %v2142_v27  ;;  %v1085_v62 = vmul.f32 %v2360_v6, %v2148_v34  ;;  %v1688_v27 = vld [vmem:[%s1977_s27] sm:$0xff]  ;;  %v1711_v51 = vld [vmem:[%s1977_s27 + $0xb8] sm:$0xff] }
 0x265   : > { %1325 = vst [vmem:[%s2358_s15 + $0x168] sm:$0xff] %v1069_v39  ;;  %1326 = vst [vmem:[%s2358_s15 + $0x170] sm:$0xff] %v1070_v41  ;;  %v1086_v10 = vmul.f32 %v2360_v6, %v2161_v52  ;;  %v1087_v21 = vmul.f32 %v2360_v6, %v2170_v1  ;;  %v1024_v34 = vmul.f32 %v1688_v27, %v2426_v61  ;;  %v1689_v52 = vld [vmem:[%s1977_s27 + $0x8] sm:$0xff]  ;;  %v1719_v27 = vld [vmem:[%s1977_s27 + $0xf8] sm:$0xff] }
 0x266   : > { %1327 = vst [vmem:[%s2358_s15 + $0x178] sm:$0xff] %v1071_v43  ;;  %1328 = vst [vmem:[%s2358_s15 + $0x180] sm:$0xff] %v1072_v45  ;;  %v1025_v1 = vmul.f32 %v1689_v52, %v2426_v61  ;;  %v1026_v4 = vmul.f32 %v1690_v3, %v2426_v61  ;;  %v1027_v6 = vmul.f32 %v1691_v5, %v2426_v61  ;;  %v1720_v52 = vld [vmem:[%s1977_s27 + $0x200] sm:$0xff]  ;;  %v1721_v3 = vld [vmem:[%s1977_s27 + $0x208] sm:$0xff] }
 0x267   : > { %1329 = vst [vmem:[%s2358_s15 + $0x188] sm:$0xff] %v1073_v47  ;;  %1330 = vst [vmem:[%s2358_s15 + $0x190] sm:$0xff] %v1074_v49  ;;  %v1028_v8 = vmul.f32 %v1692_v7, %v2426_v61  ;;  %v1029_v11 = vmul.f32 %v1693_v9, %v2426_v61  ;;  %v1030_v13 = vmul.f32 %v1694_v12, %v2426_v61 }
 0x268   : > { %1331 = vst [vmem:[%s2358_s15 + $0x198] sm:$0xff] %v1075_v53  ;;  %1332 = vst [vmem:[%s2358_s15 + $0x1a0] sm:$0xff] %v1076_v55  ;;  %v1031_v15 = vmul.f32 %v1695_v14, %v2426_v61  ;;  %v1032_v17 = vmul.f32 %v1696_v16, %v2426_v61  ;;  %v1033_v19 = vmul.f32 %v1697_v18, %v2426_v61  ;;  %v1712_v55 = vld [vmem:[%s1977_s27 + $0xc0] sm:$0xff] }
 0x269   : > { %1333 = vst [vmem:[%s2358_s15 + $0x1a8] sm:$0xff] %v1077_v57  ;;  %1334 = vst [vmem:[%s2358_s15 + $0x1b0] sm:$0xff] %v1078_v59  ;;  %v1034_v22 = vmul.f32 %v1698_v20, %v2426_v61  ;;  %v1035_v24 = vmul.f32 %v1699_v23, %v2426_v61  ;;  %v1036_v26 = vmul.f32 %v1700_v25, %v2426_v61  ;;  %v1713_v57 = vld [vmem:[%s1977_s27 + $0xc8] sm:$0xff]  ;;  %v1714_v59 = vld [vmem:[%s1977_s27 + $0xd0] sm:$0xff] }
 0x26a   : > { %1335 = vst [vmem:[%s2358_s15 + $0x1b8] sm:$0xff] %v1079_v60  ;;  %1336 = vst [vmem:[%s2358_s15 + $0x1c0] sm:$0xff] %v1080_v63  ;;  %v1037_v29 = vmul.f32 %v1701_v28, %v2426_v61  ;;  %v1038_v31 = vmul.f32 %v1702_v30, %v2426_v61  ;;  %v1039_v35 = vmul.f32 %v1703_v32, %v2426_v61  ;;  %v1715_v63 = vld [vmem:[%s1977_s27 + $0xd8] sm:$0xff] }
 0x26b   : > { %1337 = vst [vmem:[%s2358_s15 + $0x1c8] sm:$0xff] %v1081_v0  ;;  %1338 = vst [vmem:[%s2358_s15 + $0x1d0] sm:$0xff] %v1082_v33  ;;  %v1040_v37 = vmul.f32 %v1704_v36, %v2426_v61  ;;  %v1041_v39 = vmul.f32 %v1705_v38, %v2426_v61  ;;  %v1042_v41 = vmul.f32 %v1706_v40, %v2426_v61  ;;  %v1716_v33 = vld [vmem:[%s1977_s27 + $0xe0] sm:$0xff] }
 0x26c   : > { %1339 = vst [vmem:[%s2358_s15 + $0x1d8] sm:$0xff] %v1083_v2  ;;  %1340 = vst [vmem:[%s2358_s15 + $0x1e0] sm:$0xff] %v1084_v50  ;;  %v1043_v43 = vmul.f32 %v1707_v42, %v2426_v61  ;;  %v1044_v45 = vmul.f32 %v1708_v44, %v2426_v61  ;;  %v1045_v47 = vmul.f32 %v1709_v46, %v2426_v61  ;;  %v1717_v50 = vld [vmem:[%s1977_s27 + $0xe8] sm:$0xff] }
 0x26d   : > { %1341 = vst [vmem:[%s2358_s15 + $0x1e8] sm:$0xff] %v1085_v62  ;;  %1342 = vst [vmem:[%s2358_s15 + $0x1f0] sm:$0xff] %v1086_v10  ;;  %v1046_v49 = vmul.f32 %v1710_v48, %v2426_v61  ;;  %v1047_v53 = vmul.f32 %v1711_v51, %v2426_v61  ;;  %v1048_v56 = vmul.f32 %v1712_v55, %v2426_v61  ;;  %v1718_v10 = vld [vmem:[%s1977_s27 + $0xf0] sm:$0xff] }
 0x26e   : > { %1343 = vst [vmem:[%s2358_s15 + $0x1f8] sm:$0xff] %v1087_v21  ;;  %1280 = vst [vmem:[%s2358_s15] sm:$0xff] %v1024_v34  ;;  %v1049_v58 = vmul.f32 %v1713_v57, %v2426_v61  ;;  %v1050_v60 = vmul.f32 %v1714_v59, %v2426_v61  ;;  %v1051_v0 = vmul.f32 %v1715_v63, %v2426_v61  ;;  %v1744_v57 = vld [vmem:[%s1977_s27 + $0x2c0] sm:$0xff]  ;;  %v1745_v59 = vld [vmem:[%s1977_s27 + $0x2c8] sm:$0xff] }
 0x26f   : > { %1281 = vst [vmem:[%s2358_s15 + $0x8] sm:$0xff] %v1025_v1  ;;  %1282 = vst [vmem:[%s2358_s15 + $0x10] sm:$0xff] %v1026_v4  ;;  %v1052_v2 = vmul.f32 %v1716_v33, %v2426_v61  ;;  %v1053_v62 = vmul.f32 %v1717_v50, %v2426_v61  ;;  %v1054_v21 = vmul.f32 %v1718_v10, %v2426_v61  ;;  %v1722_v4 = vld [vmem:[%s1977_s27 + $0x210] sm:$0xff]  ;;  %v1747_v33 = vld [vmem:[%s1977_s27 + $0x2d8] sm:$0xff] }
 0x270   : > { %1283 = vst [vmem:[%s2358_s15 + $0x18] sm:$0xff] %v1027_v6  ;;  %1284 = vst [vmem:[%s2358_s15 + $0x20] sm:$0xff] %v1028_v8  ;;  %v1055_v34 = vmul.f32 %v1719_v27, %v2426_v61  ;;  %v1088_v1 = vmul.f32 %v1720_v52, %v2524_v54  ;;  %v1089_v61 = vmul.f32 %v1721_v3, %v2524_v54  ;;  %v1723_v6 = vld [vmem:[%s1977_s27 + $0x218] sm:$0xff]  ;;  %v1724_v8 = vld [vmem:[%s1977_s27 + $0x220] sm:$0xff] }
 0x271   : > { %1285 = vst [vmem:[%s2358_s15 + $0x28] sm:$0xff] %v1029_v11  ;;  %1286 = vst [vmem:[%s2358_s15 + $0x30] sm:$0xff] %v1030_v13  ;;  %v1090_v5 = vmul.f32 %v1722_v4, %v2524_v54  ;;  %v1091_v7 = vmul.f32 %v1723_v6, %v2524_v54  ;;  %v1092_v9 = vmul.f32 %v1724_v8, %v2524_v54  ;;  %v1725_v11 = vld [vmem:[%s1977_s27 + $0x228] sm:$0xff]  ;;  %v1726_v13 = vld [vmem:[%s1977_s27 + $0x230] sm:$0xff] }
 0x272   : > { %1287 = vst [vmem:[%s2358_s15 + $0x38] sm:$0xff] %v1031_v15  ;;  %1288 = vst [vmem:[%s2358_s15 + $0x40] sm:$0xff] %v1032_v17  ;;  %v1093_v12 = vmul.f32 %v1725_v11, %v2524_v54  ;;  %v1094_v14 = vmul.f32 %v1726_v13, %v2524_v54  ;;  %v1727_v15 = vld [vmem:[%s1977_s27 + $0x238] sm:$0xff]  ;;  %v1728_v17 = vld [vmem:[%s1977_s27 + $0x240] sm:$0xff] }
 0x273   : > { %1289 = vst [vmem:[%s2358_s15 + $0x48] sm:$0xff] %v1033_v19  ;;  %1290 = vst [vmem:[%s2358_s15 + $0x50] sm:$0xff] %v1034_v22  ;;  %v1095_v16 = vmul.f32 %v1727_v15, %v2524_v54  ;;  %v1096_v18 = vmul.f32 %v1728_v17, %v2524_v54  ;;  %v1729_v19 = vld [vmem:[%s1977_s27 + $0x248] sm:$0xff]  ;;  %v1730_v22 = vld [vmem:[%s1977_s27 + $0x250] sm:$0xff] }
 0x274   : > { %1291 = vst [vmem:[%s2358_s15 + $0x58] sm:$0xff] %v1035_v24  ;;  %1292 = vst [vmem:[%s2358_s15 + $0x60] sm:$0xff] %v1036_v26  ;;  %v1097_v20 = vmul.f32 %v1729_v19, %v2524_v54  ;;  %v1098_v23 = vmul.f32 %v1730_v22, %v2524_v54  ;;  %v1731_v24 = vld [vmem:[%s1977_s27 + $0x258] sm:$0xff]  ;;  %v1732_v26 = vld [vmem:[%s1977_s27 + $0x260] sm:$0xff] }
 0x275   : > { %1293 = vst [vmem:[%s2358_s15 + $0x68] sm:$0xff] %v1037_v29  ;;  %1294 = vst [vmem:[%s2358_s15 + $0x70] sm:$0xff] %v1038_v31  ;;  %v1099_v25 = vmul.f32 %v1731_v24, %v2524_v54  ;;  %v1100_v28 = vmul.f32 %v1732_v26, %v2524_v54  ;;  %v1733_v29 = vld [vmem:[%s1977_s27 + $0x268] sm:$0xff]  ;;  %v1734_v31 = vld [vmem:[%s1977_s27 + $0x270] sm:$0xff] }
 0x276   : > { %1295 = vst [vmem:[%s2358_s15 + $0x78] sm:$0xff] %v1039_v35  ;;  %1296 = vst [vmem:[%s2358_s15 + $0x80] sm:$0xff] %v1040_v37  ;;  %v1101_v30 = vmul.f32 %v1733_v29, %v2524_v54  ;;  %v1102_v32 = vmul.f32 %v1734_v31, %v2524_v54  ;;  %v1735_v35 = vld [vmem:[%s1977_s27 + $0x278] sm:$0xff]  ;;  %v1736_v37 = vld [vmem:[%s1977_s27 + $0x280] sm:$0xff] }
 0x277   : > { %1297 = vst [vmem:[%s2358_s15 + $0x88] sm:$0xff] %v1041_v39  ;;  %1298 = vst [vmem:[%s2358_s15 + $0x90] sm:$0xff] %v1042_v41  ;;  %v1103_v36 = vmul.f32 %v1735_v35, %v2524_v54  ;;  %v1104_v38 = vmul.f32 %v1736_v37, %v2524_v54  ;;  %v1737_v39 = vld [vmem:[%s1977_s27 + $0x288] sm:$0xff]  ;;  %v1738_v41 = vld [vmem:[%s1977_s27 + $0x290] sm:$0xff] }
 0x278   : > { %1299 = vst [vmem:[%s2358_s15 + $0x98] sm:$0xff] %v1043_v43  ;;  %1300 = vst [vmem:[%s2358_s15 + $0xa0] sm:$0xff] %v1044_v45  ;;  %v1105_v40 = vmul.f32 %v1737_v39, %v2524_v54  ;;  %v1106_v42 = vmul.f32 %v1738_v41, %v2524_v54  ;;  %v1739_v43 = vld [vmem:[%s1977_s27 + $0x298] sm:$0xff]  ;;  %v1740_v45 = vld [vmem:[%s1977_s27 + $0x2a0] sm:$0xff] }
 0x279   : > { %1301 = vst [vmem:[%s2358_s15 + $0xa8] sm:$0xff] %v1045_v47  ;;  %1302 = vst [vmem:[%s2358_s15 + $0xb0] sm:$0xff] %v1046_v49  ;;  %v1107_v44 = vmul.f32 %v1739_v43, %v2524_v54  ;;  %v1108_v46 = vmul.f32 %v1740_v45, %v2524_v54  ;;  %v1741_v47 = vld [vmem:[%s1977_s27 + $0x2a8] sm:$0xff]  ;;  %v1742_v49 = vld [vmem:[%s1977_s27 + $0x2b0] sm:$0xff] }
 0x27a   : > { %1303 = vst [vmem:[%s2358_s15 + $0xb8] sm:$0xff] %v1047_v53  ;;  %1304 = vst [vmem:[%s2358_s15 + $0xc0] sm:$0xff] %v1048_v56  ;;  %v1109_v48 = vmul.f32 %v1741_v47, %v2524_v54  ;;  %v1110_v51 = vmul.f32 %v1742_v49, %v2524_v54  ;;  %v1743_v53 = vld [vmem:[%s1977_s27 + $0x2b8] sm:$0xff]  ;;  %v2622_v56 = vpop.permute.xlu1 %1001  ;;  %v1746_v63 = vld [vmem:[%s1977_s27 + $0x2d0] sm:$0xff] }
 0x27b   : > { %1305 = vst [vmem:[%s2358_s15 + $0xc8] sm:$0xff] %v1049_v58  ;;  %1306 = vst [vmem:[%s2358_s15 + $0xd0] sm:$0xff] %v1050_v60  ;;  %v1111_v55 = vmul.f32 %v1743_v53, %v2524_v54  ;;  %v1112_v58 = vmul.f32 %v1744_v57, %v2524_v54  ;;  %v1113_v60 = vmul.f32 %v1745_v59, %v2524_v54  ;;  %v1748_v50 = vld [vmem:[%s1977_s27 + $0x2e0] sm:$0xff]  ;;  %v1749_v10 = vld [vmem:[%s1977_s27 + $0x2e8] sm:$0xff] }
 0x27c   : > { %1307 = vst [vmem:[%s2358_s15 + $0xd8] sm:$0xff] %v1051_v0  ;;  %1308 = vst [vmem:[%s2358_s15 + $0xe0] sm:$0xff] %v1052_v2  ;;  %v1114_v0 = vmul.f32 %v1746_v63, %v2524_v54  ;;  %v1115_v2 = vmul.f32 %v1747_v33, %v2524_v54  ;;  %v1750_v27 = vld [vmem:[%s1977_s27 + $0x2f0] sm:$0xff]  ;;  %v1751_v52 = vld [vmem:[%s1977_s27 + $0x2f8] sm:$0xff] }
 0x27d   : > { %1309 = vst [vmem:[%s2358_s15 + $0xe8] sm:$0xff] %v1053_v62  ;;  %1310 = vst [vmem:[%s2358_s15 + $0xf0] sm:$0xff] %v1054_v21  ;;  %v1116_v62 = vmul.f32 %v1748_v50, %v2524_v54  ;;  %v1117_v21 = vmul.f32 %v1749_v10, %v2524_v54  ;;  %v1752_v3 = vld [vmem:[%s1977_s27 + $0x300] sm:$0xff]  ;;  %v1753_v4 = vld [vmem:[%s1977_s27 + $0x308] sm:$0xff] }
 0x27e   : > { %1311 = vst [vmem:[%s2358_s15 + $0xf8] sm:$0xff] %v1055_v34  ;;  %1344 = vst [vmem:[%s2358_s15 + $0x200] sm:$0xff] %v1088_v1  ;;  %v1118_v34 = vmul.f32 %v1750_v27, %v2524_v54  ;;  %v1119_v1 = vmul.f32 %v1751_v52, %v2524_v54  ;;  %v1121_v54 = vmul.f32 %v1753_v4, %v2622_v56  ;;  %v1776_v59 = vld [vmem:[%s1977_s27 + $0x3c0] sm:$0xff]  ;;  %v1777_v63 = vld [vmem:[%s1977_s27 + $0x3c8] sm:$0xff] }
 0x27f   : > { %1345 = vst [vmem:[%s2358_s15 + $0x208] sm:$0xff] %v1089_v61  ;;  %1346 = vst [vmem:[%s2358_s15 + $0x210] sm:$0xff] %v1090_v5  ;;  %v1120_v61 = vmul.f32 %v1752_v3, %v2622_v56  ;;  %v1754_v5 = vld [vmem:[%s1977_s27 + $0x310] sm:$0xff]  ;;  %v1779_v50 = vld [vmem:[%s1977_s27 + $0x3d8] sm:$0xff] }
 0x280   : > { %1347 = vst [vmem:[%s2358_s15 + $0x218] sm:$0xff] %v1091_v7  ;;  %1348 = vst [vmem:[%s2358_s15 + $0x220] sm:$0xff] %v1092_v9  ;;  %v1122_v6 = vmul.f32 %v1754_v5, %v2622_v56  ;;  %v1755_v7 = vld [vmem:[%s1977_s27 + $0x318] sm:$0xff]  ;;  %v1756_v9 = vld [vmem:[%s1977_s27 + $0x320] sm:$0xff] }
 0x281   : > { %1349 = vst [vmem:[%s2358_s15 + $0x228] sm:$0xff] %v1093_v12  ;;  %1350 = vst [vmem:[%s2358_s15 + $0x230] sm:$0xff] %v1094_v14  ;;  %v1123_v8 = vmul.f32 %v1755_v7, %v2622_v56  ;;  %v1124_v11 = vmul.f32 %v1756_v9, %v2622_v56  ;;  %v1757_v12 = vld [vmem:[%s1977_s27 + $0x328] sm:$0xff]  ;;  %v1758_v14 = vld [vmem:[%s1977_s27 + $0x330] sm:$0xff] }
 0x282   : > { %1351 = vst [vmem:[%s2358_s15 + $0x238] sm:$0xff] %v1095_v16  ;;  %1352 = vst [vmem:[%s2358_s15 + $0x240] sm:$0xff] %v1096_v18  ;;  %v1125_v13 = vmul.f32 %v1757_v12, %v2622_v56  ;;  %v1126_v15 = vmul.f32 %v1758_v14, %v2622_v56  ;;  %v1759_v16 = vld [vmem:[%s1977_s27 + $0x338] sm:$0xff]  ;;  %v1760_v18 = vld [vmem:[%s1977_s27 + $0x340] sm:$0xff] }
 0x283   : > { %1353 = vst [vmem:[%s2358_s15 + $0x248] sm:$0xff] %v1097_v20  ;;  %1354 = vst [vmem:[%s2358_s15 + $0x250] sm:$0xff] %v1098_v23  ;;  %v1127_v17 = vmul.f32 %v1759_v16, %v2622_v56  ;;  %v1128_v19 = vmul.f32 %v1760_v18, %v2622_v56  ;;  %v1761_v20 = vld [vmem:[%s1977_s27 + $0x348] sm:$0xff]  ;;  %v1762_v23 = vld [vmem:[%s1977_s27 + $0x350] sm:$0xff] }
 0x284   : > { %1355 = vst [vmem:[%s2358_s15 + $0x258] sm:$0xff] %v1099_v25  ;;  %1356 = vst [vmem:[%s2358_s15 + $0x260] sm:$0xff] %v1100_v28  ;;  %v1129_v22 = vmul.f32 %v1761_v20, %v2622_v56  ;;  %v1130_v24 = vmul.f32 %v1762_v23, %v2622_v56  ;;  %v1763_v25 = vld [vmem:[%s1977_s27 + $0x358] sm:$0xff]  ;;  %v1764_v28 = vld [vmem:[%s1977_s27 + $0x360] sm:$0xff] }
 0x285   : > { %1357 = vst [vmem:[%s2358_s15 + $0x268] sm:$0xff] %v1101_v30  ;;  %1358 = vst [vmem:[%s2358_s15 + $0x270] sm:$0xff] %v1102_v32  ;;  %v1131_v26 = vmul.f32 %v1763_v25, %v2622_v56  ;;  %v1132_v29 = vmul.f32 %v1764_v28, %v2622_v56  ;;  %v1765_v30 = vld [vmem:[%s1977_s27 + $0x368] sm:$0xff]  ;;  %v1766_v32 = vld [vmem:[%s1977_s27 + $0x370] sm:$0xff] }
 0x286   : > { %1359 = vst [vmem:[%s2358_s15 + $0x278] sm:$0xff] %v1103_v36  ;;  %1360 = vst [vmem:[%s2358_s15 + $0x280] sm:$0xff] %v1104_v38  ;;  %v1133_v31 = vmul.f32 %v1765_v30, %v2622_v56  ;;  %v1134_v35 = vmul.f32 %v1766_v32, %v2622_v56  ;;  %v1767_v36 = vld [vmem:[%s1977_s27 + $0x378] sm:$0xff]  ;;  %v1768_v38 = vld [vmem:[%s1977_s27 + $0x380] sm:$0xff] }
 0x287   : > { %1361 = vst [vmem:[%s2358_s15 + $0x288] sm:$0xff] %v1105_v40  ;;  %1362 = vst [vmem:[%s2358_s15 + $0x290] sm:$0xff] %v1106_v42  ;;  %v1135_v37 = vmul.f32 %v1767_v36, %v2622_v56  ;;  %v1136_v39 = vmul.f32 %v1768_v38, %v2622_v56  ;;  %v1769_v40 = vld [vmem:[%s1977_s27 + $0x388] sm:$0xff]  ;;  %v1770_v42 = vld [vmem:[%s1977_s27 + $0x390] sm:$0xff] }
 0x288   : > { %1363 = vst [vmem:[%s2358_s15 + $0x298] sm:$0xff] %v1107_v44  ;;  %1364 = vst [vmem:[%s2358_s15 + $0x2a0] sm:$0xff] %v1108_v46  ;;  %v1137_v41 = vmul.f32 %v1769_v40, %v2622_v56  ;;  %v1138_v43 = vmul.f32 %v1770_v42, %v2622_v56  ;;  %v1771_v44 = vld [vmem:[%s1977_s27 + $0x398] sm:$0xff]  ;;  %v1772_v46 = vld [vmem:[%s1977_s27 + $0x3a0] sm:$0xff] }
 0x289   : > { %1365 = vst [vmem:[%s2358_s15 + $0x2a8] sm:$0xff] %v1109_v48  ;;  %1366 = vst [vmem:[%s2358_s15 + $0x2b0] sm:$0xff] %v1110_v51  ;;  %v1139_v45 = vmul.f32 %v1771_v44, %v2622_v56  ;;  %v1140_v47 = vmul.f32 %v1772_v46, %v2622_v56  ;;  %v1773_v48 = vld [vmem:[%s1977_s27 + $0x3a8] sm:$0xff]  ;;  %v1774_v51 = vld [vmem:[%s1977_s27 + $0x3b0] sm:$0xff] }
 0x28a   : > { %1367 = vst [vmem:[%s2358_s15 + $0x2b8] sm:$0xff] %v1111_v55  ;;  %1368 = vst [vmem:[%s2358_s15 + $0x2c0] sm:$0xff] %v1112_v58  ;;  %v1141_v49 = vmul.f32 %v1773_v48, %v2622_v56  ;;  %v1142_v53 = vmul.f32 %v1774_v51, %v2622_v56  ;;  %v1775_v55 = vld [vmem:[%s1977_s27 + $0x3b8] sm:$0xff]  ;;  %v2720_v58 = vpop.permute.xlu1 %1006  ;;  %v1778_v33 = vld [vmem:[%s1977_s27 + $0x3d0] sm:$0xff] }
 0x28b   : > { %1369 = vst [vmem:[%s2358_s15 + $0x2c8] sm:$0xff] %v1113_v60  ;;  %1370 = vst [vmem:[%s2358_s15 + $0x2d0] sm:$0xff] %v1114_v0  ;;  %v1143_v57 = vmul.f32 %v1775_v55, %v2622_v56  ;;  %v1144_v60 = vmul.f32 %v1776_v59, %v2622_v56  ;;  %v1145_v0 = vmul.f32 %v1777_v63, %v2622_v56  ;;  %v1780_v10 = vld [vmem:[%s1977_s27 + $0x3e0] sm:$0xff]  ;;  %v1781_v27 = vld [vmem:[%s1977_s27 + $0x3e8] sm:$0xff] }
 0x28c   : > { %1371 = vst [vmem:[%s2358_s15 + $0x2d8] sm:$0xff] %v1115_v2  ;;  %1372 = vst [vmem:[%s2358_s15 + $0x2e0] sm:$0xff] %v1116_v62  ;;  %v1146_v2 = vmul.f32 %v1778_v33, %v2622_v56  ;;  %v1147_v62 = vmul.f32 %v1779_v50, %v2622_v56  ;;  %v1782_v52 = vld [vmem:[%s1977_s27 + $0x3f0] sm:$0xff]  ;;  %v1783_v3 = vld [vmem:[%s1977_s27 + $0x3f8] sm:$0xff] }
 0x28d   : > { %1373 = vst [vmem:[%s2358_s15 + $0x2e8] sm:$0xff] %v1117_v21  ;;  %1374 = vst [vmem:[%s2358_s15 + $0x2f0] sm:$0xff] %v1118_v34  ;;  %v1148_v21 = vmul.f32 %v1780_v10, %v2622_v56  ;;  %v1149_v34 = vmul.f32 %v1781_v27, %v2622_v56  ;;  %v1784_v4 = vld [vmem:[%s1977_s27 + $0x400] sm:$0xff]  ;;  %v1785_v5 = vld [vmem:[%s1977_s27 + $0x408] sm:$0xff] }
 0x28e   : > { %1375 = vst [vmem:[%s2358_s15 + $0x2f8] sm:$0xff] %v1119_v1  ;;  %1376 = vst [vmem:[%s2358_s15 + $0x300] sm:$0xff] %v1120_v61  ;;  %v1150_v1 = vmul.f32 %v1782_v52, %v2622_v56  ;;  %v1151_v61 = vmul.f32 %v1783_v3, %v2622_v56  ;;  %v1153_v56 = vmul.f32 %v1785_v5, %v2720_v58  ;;  %v1808_v63 = vld [vmem:[%s1977_s27 + $0x4c0] sm:$0xff]  ;;  %v1809_v33 = vld [vmem:[%s1977_s27 + $0x4c8] sm:$0xff] }
 0x28f   : > { %1377 = vst [vmem:[%s2358_s15 + $0x308] sm:$0xff] %v1121_v54  ;;  %1378 = vst [vmem:[%s2358_s15 + $0x310] sm:$0xff] %v1122_v6  ;;  %v1152_v54 = vmul.f32 %v1784_v4, %v2720_v58  ;;  %v1786_v6 = vld [vmem:[%s1977_s27 + $0x410] sm:$0xff]  ;;  %v1811_v10 = vld [vmem:[%s1977_s27 + $0x4d8] sm:$0xff] }
 0x290   : > { %1379 = vst [vmem:[%s2358_s15 + $0x318] sm:$0xff] %v1123_v8  ;;  %1380 = vst [vmem:[%s2358_s15 + $0x320] sm:$0xff] %v1124_v11  ;;  %v1154_v7 = vmul.f32 %v1786_v6, %v2720_v58  ;;  %v1787_v8 = vld [vmem:[%s1977_s27 + $0x418] sm:$0xff]  ;;  %v1788_v11 = vld [vmem:[%s1977_s27 + $0x420] sm:$0xff] }
 0x291   : > { %1381 = vst [vmem:[%s2358_s15 + $0x328] sm:$0xff] %v1125_v13  ;;  %1382 = vst [vmem:[%s2358_s15 + $0x330] sm:$0xff] %v1126_v15  ;;  %v1155_v9 = vmul.f32 %v1787_v8, %v2720_v58  ;;  %v1156_v12 = vmul.f32 %v1788_v11, %v2720_v58  ;;  %v1789_v13 = vld [vmem:[%s1977_s27 + $0x428] sm:$0xff]  ;;  %v1790_v15 = vld [vmem:[%s1977_s27 + $0x430] sm:$0xff] }
 0x292   : > { %1383 = vst [vmem:[%s2358_s15 + $0x338] sm:$0xff] %v1127_v17  ;;  %1384 = vst [vmem:[%s2358_s15 + $0x340] sm:$0xff] %v1128_v19  ;;  %v1157_v14 = vmul.f32 %v1789_v13, %v2720_v58  ;;  %v1158_v16 = vmul.f32 %v1790_v15, %v2720_v58  ;;  %v1791_v17 = vld [vmem:[%s1977_s27 + $0x438] sm:$0xff]  ;;  %v1792_v19 = vld [vmem:[%s1977_s27 + $0x440] sm:$0xff] }
 0x293   : > { %1385 = vst [vmem:[%s2358_s15 + $0x348] sm:$0xff] %v1129_v22  ;;  %1386 = vst [vmem:[%s2358_s15 + $0x350] sm:$0xff] %v1130_v24  ;;  %v1159_v18 = vmul.f32 %v1791_v17, %v2720_v58  ;;  %v1160_v20 = vmul.f32 %v1792_v19, %v2720_v58  ;;  %v1793_v22 = vld [vmem:[%s1977_s27 + $0x448] sm:$0xff]  ;;  %v1794_v24 = vld [vmem:[%s1977_s27 + $0x450] sm:$0xff] }
 0x294   : > { %1387 = vst [vmem:[%s2358_s15 + $0x358] sm:$0xff] %v1131_v26  ;;  %1388 = vst [vmem:[%s2358_s15 + $0x360] sm:$0xff] %v1132_v29  ;;  %v1161_v23 = vmul.f32 %v1793_v22, %v2720_v58  ;;  %v1162_v25 = vmul.f32 %v1794_v24, %v2720_v58  ;;  %v1795_v26 = vld [vmem:[%s1977_s27 + $0x458] sm:$0xff]  ;;  %v1796_v29 = vld [vmem:[%s1977_s27 + $0x460] sm:$0xff] }
 0x295   : > { %1389 = vst [vmem:[%s2358_s15 + $0x368] sm:$0xff] %v1133_v31  ;;  %1390 = vst [vmem:[%s2358_s15 + $0x370] sm:$0xff] %v1134_v35  ;;  %v1163_v28 = vmul.f32 %v1795_v26, %v2720_v58  ;;  %v1164_v30 = vmul.f32 %v1796_v29, %v2720_v58  ;;  %v1797_v31 = vld [vmem:[%s1977_s27 + $0x468] sm:$0xff]  ;;  %v1798_v35 = vld [vmem:[%s1977_s27 + $0x470] sm:$0xff] }
 0x296   : > { %1391 = vst [vmem:[%s2358_s15 + $0x378] sm:$0xff] %v1135_v37  ;;  %1392 = vst [vmem:[%s2358_s15 + $0x380] sm:$0xff] %v1136_v39  ;;  %v1165_v32 = vmul.f32 %v1797_v31, %v2720_v58  ;;  %v1166_v36 = vmul.f32 %v1798_v35, %v2720_v58  ;;  %v1799_v37 = vld [vmem:[%s1977_s27 + $0x478] sm:$0xff]  ;;  %v1800_v39 = vld [vmem:[%s1977_s27 + $0x480] sm:$0xff] }
 0x297   : > { %1393 = vst [vmem:[%s2358_s15 + $0x388] sm:$0xff] %v1137_v41  ;;  %1394 = vst [vmem:[%s2358_s15 + $0x390] sm:$0xff] %v1138_v43  ;;  %v1167_v38 = vmul.f32 %v1799_v37, %v2720_v58  ;;  %v1168_v40 = vmul.f32 %v1800_v39, %v2720_v58  ;;  %v1801_v41 = vld [vmem:[%s1977_s27 + $0x488] sm:$0xff]  ;;  %v1802_v43 = vld [vmem:[%s1977_s27 + $0x490] sm:$0xff] }
 0x298   : > { %1395 = vst [vmem:[%s2358_s15 + $0x398] sm:$0xff] %v1139_v45  ;;  %1396 = vst [vmem:[%s2358_s15 + $0x3a0] sm:$0xff] %v1140_v47  ;;  %v1169_v42 = vmul.f32 %v1801_v41, %v2720_v58  ;;  %v1170_v44 = vmul.f32 %v1802_v43, %v2720_v58  ;;  %v1803_v45 = vld [vmem:[%s1977_s27 + $0x498] sm:$0xff]  ;;  %v1804_v47 = vld [vmem:[%s1977_s27 + $0x4a0] sm:$0xff] }
 0x299   : > { %1397 = vst [vmem:[%s2358_s15 + $0x3a8] sm:$0xff] %v1141_v49  ;;  %1398 = vst [vmem:[%s2358_s15 + $0x3b0] sm:$0xff] %v1142_v53  ;;  %v1171_v46 = vmul.f32 %v1803_v45, %v2720_v58  ;;  %v1172_v48 = vmul.f32 %v1804_v47, %v2720_v58  ;;  %v1805_v49 = vld [vmem:[%s1977_s27 + $0x4a8] sm:$0xff]  ;;  %v1806_v53 = vld [vmem:[%s1977_s27 + $0x4b0] sm:$0xff] }
 0x29a   : > { %1399 = vst [vmem:[%s2358_s15 + $0x3b8] sm:$0xff] %v1143_v57  ;;  %1400 = vst [vmem:[%s2358_s15 + $0x3c0] sm:$0xff] %v1144_v60  ;;  %v1173_v51 = vmul.f32 %v1805_v49, %v2720_v58  ;;  %v1174_v55 = vmul.f32 %v1806_v53, %v2720_v58  ;;  %v1807_v57 = vld [vmem:[%s1977_s27 + $0x4b8] sm:$0xff]  ;;  %v2818_v60 = vpop.permute.xlu1 %1011  ;;  %v1810_v50 = vld [vmem:[%s1977_s27 + $0x4d0] sm:$0xff] }
 0x29b   : > { %1401 = vst [vmem:[%s2358_s15 + $0x3c8] sm:$0xff] %v1145_v0  ;;  %1402 = vst [vmem:[%s2358_s15 + $0x3d0] sm:$0xff] %v1146_v2  ;;  %v1175_v59 = vmul.f32 %v1807_v57, %v2720_v58  ;;  %v1176_v0 = vmul.f32 %v1808_v63, %v2720_v58  ;;  %v1177_v2 = vmul.f32 %v1809_v33, %v2720_v58  ;;  %v1812_v27 = vld [vmem:[%s1977_s27 + $0x4e0] sm:$0xff]  ;;  %v1813_v52 = vld [vmem:[%s1977_s27 + $0x4e8] sm:$0xff] }
 0x29c   : > { %1403 = vst [vmem:[%s2358_s15 + $0x3d8] sm:$0xff] %v1147_v62  ;;  %1404 = vst [vmem:[%s2358_s15 + $0x3e0] sm:$0xff] %v1148_v21  ;;  %v1178_v62 = vmul.f32 %v1810_v50, %v2720_v58  ;;  %v1179_v21 = vmul.f32 %v1811_v10, %v2720_v58  ;;  %v1814_v3 = vld [vmem:[%s1977_s27 + $0x4f0] sm:$0xff]  ;;  %v1815_v4 = vld [vmem:[%s1977_s27 + $0x4f8] sm:$0xff] }
 0x29d   : > { %1405 = vst [vmem:[%s2358_s15 + $0x3e8] sm:$0xff] %v1149_v34  ;;  %1406 = vst [vmem:[%s2358_s15 + $0x3f0] sm:$0xff] %v1150_v1  ;;  %v1180_v34 = vmul.f32 %v1812_v27, %v2720_v58  ;;  %v1181_v1 = vmul.f32 %v1813_v52, %v2720_v58  ;;  %v1816_v5 = vld [vmem:[%s1977_s27 + $0x500] sm:$0xff]  ;;  %v1817_v6 = vld [vmem:[%s1977_s27 + $0x508] sm:$0xff] }
 0x29e   : > { %1407 = vst [vmem:[%s2358_s15 + $0x3f8] sm:$0xff] %v1151_v61  ;;  %1408 = vst [vmem:[%s2358_s15 + $0x400] sm:$0xff] %v1152_v54  ;;  %v1182_v61 = vmul.f32 %v1814_v3, %v2720_v58  ;;  %v1183_v54 = vmul.f32 %v1815_v4, %v2720_v58  ;;  %v1185_v58 = vmul.f32 %v1817_v6, %v2818_v60  ;;  %v1840_v33 = vld [vmem:[%s1977_s27 + $0x5c0] sm:$0xff]  ;;  %v1841_v50 = vld [vmem:[%s1977_s27 + $0x5c8] sm:$0xff] }
 0x29f   : > { %1409 = vst [vmem:[%s2358_s15 + $0x408] sm:$0xff] %v1153_v56  ;;  %1410 = vst [vmem:[%s2358_s15 + $0x410] sm:$0xff] %v1154_v7  ;;  %v1184_v56 = vmul.f32 %v1816_v5, %v2818_v60  ;;  %v1818_v7 = vld [vmem:[%s1977_s27 + $0x510] sm:$0xff]  ;;  %v1843_v27 = vld [vmem:[%s1977_s27 + $0x5d8] sm:$0xff] }
 0x2a0   : > { %1411 = vst [vmem:[%s2358_s15 + $0x418] sm:$0xff] %v1155_v9  ;;  %1412 = vst [vmem:[%s2358_s15 + $0x420] sm:$0xff] %v1156_v12  ;;  %v1186_v8 = vmul.f32 %v1818_v7, %v2818_v60  ;;  %v1819_v9 = vld [vmem:[%s1977_s27 + $0x518] sm:$0xff]  ;;  %v1820_v12 = vld [vmem:[%s1977_s27 + $0x520] sm:$0xff] }
 0x2a1   : > { %1413 = vst [vmem:[%s2358_s15 + $0x428] sm:$0xff] %v1157_v14  ;;  %1414 = vst [vmem:[%s2358_s15 + $0x430] sm:$0xff] %v1158_v16  ;;  %v1187_v11 = vmul.f32 %v1819_v9, %v2818_v60  ;;  %v1188_v13 = vmul.f32 %v1820_v12, %v2818_v60  ;;  %v1821_v14 = vld [vmem:[%s1977_s27 + $0x528] sm:$0xff]  ;;  %v1822_v16 = vld [vmem:[%s1977_s27 + $0x530] sm:$0xff] }
 0x2a2   : > { %1415 = vst [vmem:[%s2358_s15 + $0x438] sm:$0xff] %v1159_v18  ;;  %1416 = vst [vmem:[%s2358_s15 + $0x440] sm:$0xff] %v1160_v20  ;;  %v1189_v15 = vmul.f32 %v1821_v14, %v2818_v60  ;;  %v1190_v17 = vmul.f32 %v1822_v16, %v2818_v60  ;;  %v1823_v18 = vld [vmem:[%s1977_s27 + $0x538] sm:$0xff]  ;;  %v1824_v20 = vld [vmem:[%s1977_s27 + $0x540] sm:$0xff] }
 0x2a3   : > { %1417 = vst [vmem:[%s2358_s15 + $0x448] sm:$0xff] %v1161_v23  ;;  %1418 = vst [vmem:[%s2358_s15 + $0x450] sm:$0xff] %v1162_v25  ;;  %v1191_v19 = vmul.f32 %v1823_v18, %v2818_v60  ;;  %v1192_v22 = vmul.f32 %v1824_v20, %v2818_v60  ;;  %v1825_v23 = vld [vmem:[%s1977_s27 + $0x548] sm:$0xff]  ;;  %v1826_v25 = vld [vmem:[%s1977_s27 + $0x550] sm:$0xff] }
 0x2a4   : > { %1419 = vst [vmem:[%s2358_s15 + $0x458] sm:$0xff] %v1163_v28  ;;  %1420 = vst [vmem:[%s2358_s15 + $0x460] sm:$0xff] %v1164_v30  ;;  %v1193_v24 = vmul.f32 %v1825_v23, %v2818_v60  ;;  %v1194_v26 = vmul.f32 %v1826_v25, %v2818_v60  ;;  %v1827_v28 = vld [vmem:[%s1977_s27 + $0x558] sm:$0xff]  ;;  %v1828_v30 = vld [vmem:[%s1977_s27 + $0x560] sm:$0xff] }
 0x2a5   : > { %1421 = vst [vmem:[%s2358_s15 + $0x468] sm:$0xff] %v1165_v32  ;;  %1422 = vst [vmem:[%s2358_s15 + $0x470] sm:$0xff] %v1166_v36  ;;  %v1195_v29 = vmul.f32 %v1827_v28, %v2818_v60  ;;  %v1196_v31 = vmul.f32 %v1828_v30, %v2818_v60  ;;  %v1829_v32 = vld [vmem:[%s1977_s27 + $0x568] sm:$0xff]  ;;  %v1830_v36 = vld [vmem:[%s1977_s27 + $0x570] sm:$0xff] }
 0x2a6   : > { %1423 = vst [vmem:[%s2358_s15 + $0x478] sm:$0xff] %v1167_v38  ;;  %1424 = vst [vmem:[%s2358_s15 + $0x480] sm:$0xff] %v1168_v40  ;;  %v1197_v35 = vmul.f32 %v1829_v32, %v2818_v60  ;;  %v1198_v37 = vmul.f32 %v1830_v36, %v2818_v60  ;;  %v1831_v38 = vld [vmem:[%s1977_s27 + $0x578] sm:$0xff]  ;;  %v1832_v40 = vld [vmem:[%s1977_s27 + $0x580] sm:$0xff] }
 0x2a7   : > { %1425 = vst [vmem:[%s2358_s15 + $0x488] sm:$0xff] %v1169_v42  ;;  %1426 = vst [vmem:[%s2358_s15 + $0x490] sm:$0xff] %v1170_v44  ;;  %v1199_v39 = vmul.f32 %v1831_v38, %v2818_v60  ;;  %v1200_v41 = vmul.f32 %v1832_v40, %v2818_v60  ;;  %v1833_v42 = vld [vmem:[%s1977_s27 + $0x588] sm:$0xff]  ;;  %v1834_v44 = vld [vmem:[%s1977_s27 + $0x590] sm:$0xff] }
 0x2a8   : > { %1427 = vst [vmem:[%s2358_s15 + $0x498] sm:$0xff] %v1171_v46  ;;  %1428 = vst [vmem:[%s2358_s15 + $0x4a0] sm:$0xff] %v1172_v48  ;;  %v1201_v43 = vmul.f32 %v1833_v42, %v2818_v60  ;;  %v1202_v45 = vmul.f32 %v1834_v44, %v2818_v60  ;;  %v1835_v46 = vld [vmem:[%s1977_s27 + $0x598] sm:$0xff]  ;;  %v1836_v48 = vld [vmem:[%s1977_s27 + $0x5a0] sm:$0xff] }
 0x2a9   : > { %1429 = vst [vmem:[%s2358_s15 + $0x4a8] sm:$0xff] %v1173_v51  ;;  %1430 = vst [vmem:[%s2358_s15 + $0x4b0] sm:$0xff] %v1174_v55  ;;  %v1203_v47 = vmul.f32 %v1835_v46, %v2818_v60  ;;  %v1204_v49 = vmul.f32 %v1836_v48, %v2818_v60  ;;  %v1837_v51 = vld [vmem:[%s1977_s27 + $0x5a8] sm:$0xff]  ;;  %v1838_v55 = vld [vmem:[%s1977_s27 + $0x5b0] sm:$0xff] }
 0x2aa   : > { %1431 = vst [vmem:[%s2358_s15 + $0x4b8] sm:$0xff] %v1175_v59  ;;  %1432 = vst [vmem:[%s2358_s15 + $0x4c0] sm:$0xff] %v1176_v0  ;;  %v1205_v53 = vmul.f32 %v1837_v51, %v2818_v60  ;;  %v1206_v57 = vmul.f32 %v1838_v55, %v2818_v60  ;;  %v1839_v59 = vld [vmem:[%s1977_s27 + $0x5b8] sm:$0xff]  ;;  %v2916_v0 = vpop.permute.xlu1 %1016  ;;  %v1842_v10 = vld [vmem:[%s1977_s27 + $0x5d0] sm:$0xff] }
 0x2ab   : > { %1433 = vst [vmem:[%s2358_s15 + $0x4c8] sm:$0xff] %v1177_v2  ;;  %1434 = vst [vmem:[%s2358_s15 + $0x4d0] sm:$0xff] %v1178_v62  ;;  %v1207_v63 = vmul.f32 %v1839_v59, %v2818_v60  ;;  %v1208_v2 = vmul.f32 %v1840_v33, %v2818_v60  ;;  %v1209_v62 = vmul.f32 %v1841_v50, %v2818_v60  ;;  %v1844_v52 = vld [vmem:[%s1977_s27 + $0x5e0] sm:$0xff]  ;;  %v1845_v3 = vld [vmem:[%s1977_s27 + $0x5e8] sm:$0xff] }
 0x2ac   : > { %1435 = vst [vmem:[%s2358_s15 + $0x4d8] sm:$0xff] %v1179_v21  ;;  %1436 = vst [vmem:[%s2358_s15 + $0x4e0] sm:$0xff] %v1180_v34  ;;  %v1210_v21 = vmul.f32 %v1842_v10, %v2818_v60  ;;  %v1211_v34 = vmul.f32 %v1843_v27, %v2818_v60  ;;  %v1846_v4 = vld [vmem:[%s1977_s27 + $0x5f0] sm:$0xff]  ;;  %v1847_v5 = vld [vmem:[%s1977_s27 + $0x5f8] sm:$0xff] }
 0x2ad   : > { %1437 = vst [vmem:[%s2358_s15 + $0x4e8] sm:$0xff] %v1181_v1  ;;  %1438 = vst [vmem:[%s2358_s15 + $0x4f0] sm:$0xff] %v1182_v61  ;;  %v1212_v1 = vmul.f32 %v1844_v52, %v2818_v60  ;;  %v1213_v61 = vmul.f32 %v1845_v3, %v2818_v60  ;;  %v1848_v6 = vld [vmem:[%s1977_s27 + $0x600] sm:$0xff]  ;;  %v1849_v7 = vld [vmem:[%s1977_s27 + $0x608] sm:$0xff] }
 0x2ae   : > { %1439 = vst [vmem:[%s2358_s15 + $0x4f8] sm:$0xff] %v1183_v54  ;;  %1440 = vst [vmem:[%s2358_s15 + $0x500] sm:$0xff] %v1184_v56  ;;  %v1214_v54 = vmul.f32 %v1846_v4, %v2818_v60  ;;  %v1215_v56 = vmul.f32 %v1847_v5, %v2818_v60  ;;  %v1217_v60 = vmul.f32 %v1849_v7, %v2916_v0  ;;  %v1872_v50 = vld [vmem:[%s1977_s27 + $0x6c0] sm:$0xff]  ;;  %v1873_v10 = vld [vmem:[%s1977_s27 + $0x6c8] sm:$0xff] }
 0x2af   : > { %1441 = vst [vmem:[%s2358_s15 + $0x508] sm:$0xff] %v1185_v58  ;;  %1442 = vst [vmem:[%s2358_s15 + $0x510] sm:$0xff] %v1186_v8  ;;  %v1216_v58 = vmul.f32 %v1848_v6, %v2916_v0  ;;  %v1850_v8 = vld [vmem:[%s1977_s27 + $0x610] sm:$0xff]  ;;  %v1875_v52 = vld [vmem:[%s1977_s27 + $0x6d8] sm:$0xff] }
 0x2b0   : > { %1443 = vst [vmem:[%s2358_s15 + $0x518] sm:$0xff] %v1187_v11  ;;  %1444 = vst [vmem:[%s2358_s15 + $0x520] sm:$0xff] %v1188_v13  ;;  %v1218_v9 = vmul.f32 %v1850_v8, %v2916_v0  ;;  %v1851_v11 = vld [vmem:[%s1977_s27 + $0x618] sm:$0xff]  ;;  %v1852_v13 = vld [vmem:[%s1977_s27 + $0x620] sm:$0xff] }
 0x2b1   : > { %1445 = vst [vmem:[%s2358_s15 + $0x528] sm:$0xff] %v1189_v15  ;;  %1446 = vst [vmem:[%s2358_s15 + $0x530] sm:$0xff] %v1190_v17  ;;  %v1219_v12 = vmul.f32 %v1851_v11, %v2916_v0  ;;  %v1220_v14 = vmul.f32 %v1852_v13, %v2916_v0  ;;  %v1853_v15 = vld [vmem:[%s1977_s27 + $0x628] sm:$0xff]  ;;  %v1854_v17 = vld [vmem:[%s1977_s27 + $0x630] sm:$0xff] }
 0x2b2   : > { %1447 = vst [vmem:[%s2358_s15 + $0x538] sm:$0xff] %v1191_v19  ;;  %1448 = vst [vmem:[%s2358_s15 + $0x540] sm:$0xff] %v1192_v22  ;;  %v1221_v16 = vmul.f32 %v1853_v15, %v2916_v0  ;;  %v1222_v18 = vmul.f32 %v1854_v17, %v2916_v0  ;;  %v1855_v19 = vld [vmem:[%s1977_s27 + $0x638] sm:$0xff]  ;;  %v1856_v22 = vld [vmem:[%s1977_s27 + $0x640] sm:$0xff] }
 0x2b3   : > { %1449 = vst [vmem:[%s2358_s15 + $0x548] sm:$0xff] %v1193_v24  ;;  %1450 = vst [vmem:[%s2358_s15 + $0x550] sm:$0xff] %v1194_v26  ;;  %v1223_v20 = vmul.f32 %v1855_v19, %v2916_v0  ;;  %v1224_v23 = vmul.f32 %v1856_v22, %v2916_v0  ;;  %v1857_v24 = vld [vmem:[%s1977_s27 + $0x648] sm:$0xff]  ;;  %v1858_v26 = vld [vmem:[%s1977_s27 + $0x650] sm:$0xff] }
 0x2b4   : > { %1451 = vst [vmem:[%s2358_s15 + $0x558] sm:$0xff] %v1195_v29  ;;  %1452 = vst [vmem:[%s2358_s15 + $0x560] sm:$0xff] %v1196_v31  ;;  %v1225_v25 = vmul.f32 %v1857_v24, %v2916_v0  ;;  %v1226_v28 = vmul.f32 %v1858_v26, %v2916_v0  ;;  %v1859_v29 = vld [vmem:[%s1977_s27 + $0x658] sm:$0xff]  ;;  %v1860_v31 = vld [vmem:[%s1977_s27 + $0x660] sm:$0xff] }
 0x2b5   : > { %1453 = vst [vmem:[%s2358_s15 + $0x568] sm:$0xff] %v1197_v35  ;;  %1454 = vst [vmem:[%s2358_s15 + $0x570] sm:$0xff] %v1198_v37  ;;  %v1227_v30 = vmul.f32 %v1859_v29, %v2916_v0  ;;  %v1228_v32 = vmul.f32 %v1860_v31, %v2916_v0  ;;  %v1861_v35 = vld [vmem:[%s1977_s27 + $0x668] sm:$0xff]  ;;  %v1862_v37 = vld [vmem:[%s1977_s27 + $0x670] sm:$0xff] }
 0x2b6   : > { %1455 = vst [vmem:[%s2358_s15 + $0x578] sm:$0xff] %v1199_v39  ;;  %1456 = vst [vmem:[%s2358_s15 + $0x580] sm:$0xff] %v1200_v41  ;;  %v1229_v36 = vmul.f32 %v1861_v35, %v2916_v0  ;;  %v1230_v38 = vmul.f32 %v1862_v37, %v2916_v0  ;;  %v1863_v39 = vld [vmem:[%s1977_s27 + $0x678] sm:$0xff]  ;;  %v1864_v41 = vld [vmem:[%s1977_s27 + $0x680] sm:$0xff] }
 0x2b7   : > { %1457 = vst [vmem:[%s2358_s15 + $0x588] sm:$0xff] %v1201_v43  ;;  %1458 = vst [vmem:[%s2358_s15 + $0x590] sm:$0xff] %v1202_v45  ;;  %v1231_v40 = vmul.f32 %v1863_v39, %v2916_v0  ;;  %v1232_v42 = vmul.f32 %v1864_v41, %v2916_v0  ;;  %v1865_v43 = vld [vmem:[%s1977_s27 + $0x688] sm:$0xff]  ;;  %v1866_v45 = vld [vmem:[%s1977_s27 + $0x690] sm:$0xff] }
 0x2b8   : > { %1459 = vst [vmem:[%s2358_s15 + $0x598] sm:$0xff] %v1203_v47  ;;  %1460 = vst [vmem:[%s2358_s15 + $0x5a0] sm:$0xff] %v1204_v49  ;;  %v1233_v44 = vmul.f32 %v1865_v43, %v2916_v0  ;;  %v1234_v46 = vmul.f32 %v1866_v45, %v2916_v0  ;;  %v1867_v47 = vld [vmem:[%s1977_s27 + $0x698] sm:$0xff]  ;;  %v1868_v49 = vld [vmem:[%s1977_s27 + $0x6a0] sm:$0xff] }
 0x2b9   : > { %1461 = vst [vmem:[%s2358_s15 + $0x5a8] sm:$0xff] %v1205_v53  ;;  %1462 = vst [vmem:[%s2358_s15 + $0x5b0] sm:$0xff] %v1206_v57  ;;  %v1235_v48 = vmul.f32 %v1867_v47, %v2916_v0  ;;  %v1236_v51 = vmul.f32 %v1868_v49, %v2916_v0  ;;  %v1869_v53 = vld [vmem:[%s1977_s27 + $0x6a8] sm:$0xff]  ;;  %v1870_v57 = vld [vmem:[%s1977_s27 + $0x6b0] sm:$0xff] }
 0x2ba   : > { %1463 = vst [vmem:[%s2358_s15 + $0x5b8] sm:$0xff] %v1207_v63  ;;  %1464 = vst [vmem:[%s2358_s15 + $0x5c0] sm:$0xff] %v1208_v2  ;;  %v1237_v55 = vmul.f32 %v1869_v53, %v2916_v0  ;;  %v1238_v59 = vmul.f32 %v1870_v57, %v2916_v0  ;;  %v1871_v63 = vld [vmem:[%s1977_s27 + $0x6b8] sm:$0xff]  ;;  %v3014_v2 = vpop.permute.xlu1 %1021  ;;  %v1874_v27 = vld [vmem:[%s1977_s27 + $0x6d0] sm:$0xff] }
 0x2bb   : > { %1465 = vst [vmem:[%s2358_s15 + $0x5c8] sm:$0xff] %v1209_v62  ;;  %1466 = vst [vmem:[%s2358_s15 + $0x5d0] sm:$0xff] %v1210_v21  ;;  %v1239_v33 = vmul.f32 %v1871_v63, %v2916_v0  ;;  %v1240_v62 = vmul.f32 %v1872_v50, %v2916_v0  ;;  %v1241_v21 = vmul.f32 %v1873_v10, %v2916_v0  ;;  %v1876_v3 = vld [vmem:[%s1977_s27 + $0x6e0] sm:$0xff]  ;;  %v1877_v4 = vld [vmem:[%s1977_s27 + $0x6e8] sm:$0xff] }
 0x2bc   : > { %1467 = vst [vmem:[%s2358_s15 + $0x5d8] sm:$0xff] %v1211_v34  ;;  %1468 = vst [vmem:[%s2358_s15 + $0x5e0] sm:$0xff] %v1212_v1  ;;  %v1242_v34 = vmul.f32 %v1874_v27, %v2916_v0  ;;  %v1243_v1 = vmul.f32 %v1875_v52, %v2916_v0  ;;  %v1878_v5 = vld [vmem:[%s1977_s27 + $0x6f0] sm:$0xff]  ;;  %v1879_v6 = vld [vmem:[%s1977_s27 + $0x6f8] sm:$0xff] }
 0x2bd   : > { %1469 = vst [vmem:[%s2358_s15 + $0x5e8] sm:$0xff] %v1213_v61  ;;  %1470 = vst [vmem:[%s2358_s15 + $0x5f0] sm:$0xff] %v1214_v54  ;;  %v1244_v61 = vmul.f32 %v1876_v3, %v2916_v0  ;;  %v1245_v54 = vmul.f32 %v1877_v4, %v2916_v0  ;;  %v1880_v7 = vld [vmem:[%s1977_s27 + $0x700] sm:$0xff]  ;;  %v1881_v8 = vld [vmem:[%s1977_s27 + $0x708] sm:$0xff] }
 0x2be   : > { %1471 = vst [vmem:[%s2358_s15 + $0x5f8] sm:$0xff] %v1215_v56  ;;  %1472 = vst [vmem:[%s2358_s15 + $0x600] sm:$0xff] %v1216_v58  ;;  %v1246_v56 = vmul.f32 %v1878_v5, %v2916_v0  ;;  %v1247_v58 = vmul.f32 %v1879_v6, %v2916_v0  ;;  %v1249_v0 = vmul.f32 %v1881_v8, %v3014_v2 }
 0x2bf   : > { %1473 = vst [vmem:[%s2358_s15 + $0x608] sm:$0xff] %v1217_v60  ;;  %1474 = vst [vmem:[%s2358_s15 + $0x610] sm:$0xff] %v1218_v9  ;;  %v1248_v60 = vmul.f32 %v1880_v7, %v3014_v2  ;;  %v1882_v9 = vld [vmem:[%s1977_s27 + $0x710] sm:$0xff] }
 0x2c0   : > { %1475 = vst [vmem:[%s2358_s15 + $0x618] sm:$0xff] %v1219_v12  ;;  %1476 = vst [vmem:[%s2358_s15 + $0x620] sm:$0xff] %v1220_v14  ;;  %v1250_v11 = vmul.f32 %v1882_v9, %v3014_v2  ;;  %v1883_v12 = vld [vmem:[%s1977_s27 + $0x718] sm:$0xff]  ;;  %v1884_v14 = vld [vmem:[%s1977_s27 + $0x720] sm:$0xff] }
 0x2c1   : > { %1477 = vst [vmem:[%s2358_s15 + $0x628] sm:$0xff] %v1221_v16  ;;  %1478 = vst [vmem:[%s2358_s15 + $0x630] sm:$0xff] %v1222_v18  ;;  %v1251_v13 = vmul.f32 %v1883_v12, %v3014_v2  ;;  %v1252_v15 = vmul.f32 %v1884_v14, %v3014_v2  ;;  %v1885_v16 = vld [vmem:[%s1977_s27 + $0x728] sm:$0xff]  ;;  %v1886_v18 = vld [vmem:[%s1977_s27 + $0x730] sm:$0xff] }
 0x2c2   : > { %1479 = vst [vmem:[%s2358_s15 + $0x638] sm:$0xff] %v1223_v20  ;;  %1480 = vst [vmem:[%s2358_s15 + $0x640] sm:$0xff] %v1224_v23  ;;  %v1253_v17 = vmul.f32 %v1885_v16, %v3014_v2  ;;  %v1254_v19 = vmul.f32 %v1886_v18, %v3014_v2  ;;  %v1887_v20 = vld [vmem:[%s1977_s27 + $0x738] sm:$0xff]  ;;  %v1888_v23 = vld [vmem:[%s1977_s27 + $0x740] sm:$0xff] }
 0x2c3   : > { %1481 = vst [vmem:[%s2358_s15 + $0x648] sm:$0xff] %v1225_v25  ;;  %1482 = vst [vmem:[%s2358_s15 + $0x650] sm:$0xff] %v1226_v28  ;;  %v1255_v22 = vmul.f32 %v1887_v20, %v3014_v2  ;;  %v1256_v24 = vmul.f32 %v1888_v23, %v3014_v2  ;;  %v1889_v25 = vld [vmem:[%s1977_s27 + $0x748] sm:$0xff]  ;;  %v1890_v28 = vld [vmem:[%s1977_s27 + $0x750] sm:$0xff] }
 0x2c4   : > { %1483 = vst [vmem:[%s2358_s15 + $0x658] sm:$0xff] %v1227_v30  ;;  %1484 = vst [vmem:[%s2358_s15 + $0x660] sm:$0xff] %v1228_v32  ;;  %v1257_v26 = vmul.f32 %v1889_v25, %v3014_v2  ;;  %v1258_v29 = vmul.f32 %v1890_v28, %v3014_v2  ;;  %v1891_v30 = vld [vmem:[%s1977_s27 + $0x758] sm:$0xff]  ;;  %v1892_v32 = vld [vmem:[%s1977_s27 + $0x760] sm:$0xff] }
 0x2c5   : > { %1485 = vst [vmem:[%s2358_s15 + $0x668] sm:$0xff] %v1229_v36  ;;  %1486 = vst [vmem:[%s2358_s15 + $0x670] sm:$0xff] %v1230_v38  ;;  %v1259_v31 = vmul.f32 %v1891_v30, %v3014_v2  ;;  %v1260_v35 = vmul.f32 %v1892_v32, %v3014_v2  ;;  %v1893_v36 = vld [vmem:[%s1977_s27 + $0x768] sm:$0xff]  ;;  %v1894_v38 = vld [vmem:[%s1977_s27 + $0x770] sm:$0xff] }
 0x2c6   : > { %1487 = vst [vmem:[%s2358_s15 + $0x678] sm:$0xff] %v1231_v40  ;;  %1488 = vst [vmem:[%s2358_s15 + $0x680] sm:$0xff] %v1232_v42  ;;  %v1261_v37 = vmul.f32 %v1893_v36, %v3014_v2  ;;  %v1262_v39 = vmul.f32 %v1894_v38, %v3014_v2  ;;  %v1895_v40 = vld [vmem:[%s1977_s27 + $0x778] sm:$0xff]  ;;  %v1896_v42 = vld [vmem:[%s1977_s27 + $0x780] sm:$0xff] }
 0x2c7   : > { %1489 = vst [vmem:[%s2358_s15 + $0x688] sm:$0xff] %v1233_v44  ;;  %1490 = vst [vmem:[%s2358_s15 + $0x690] sm:$0xff] %v1234_v46  ;;  %v1263_v41 = vmul.f32 %v1895_v40, %v3014_v2  ;;  %v1264_v43 = vmul.f32 %v1896_v42, %v3014_v2  ;;  %v1897_v44 = vld [vmem:[%s1977_s27 + $0x788] sm:$0xff]  ;;  %v1898_v46 = vld [vmem:[%s1977_s27 + $0x790] sm:$0xff] }
 0x2c8   : > { %1491 = vst [vmem:[%s2358_s15 + $0x698] sm:$0xff] %v1235_v48  ;;  %1492 = vst [vmem:[%s2358_s15 + $0x6a0] sm:$0xff] %v1236_v51  ;;  %v1265_v45 = vmul.f32 %v1897_v44, %v3014_v2  ;;  %v1266_v47 = vmul.f32 %v1898_v46, %v3014_v2  ;;  %v1899_v48 = vld [vmem:[%s1977_s27 + $0x798] sm:$0xff]  ;;  %v1900_v51 = vld [vmem:[%s1977_s27 + $0x7a0] sm:$0xff] }
 0x2c9   : > { %1493 = vst [vmem:[%s2358_s15 + $0x6a8] sm:$0xff] %v1237_v55  ;;  %1494 = vst [vmem:[%s2358_s15 + $0x6b0] sm:$0xff] %v1238_v59  ;;  %v1267_v49 = vmul.f32 %v1899_v48, %v3014_v2  ;;  %v1268_v53 = vmul.f32 %v1900_v51, %v3014_v2  ;;  %v1901_v55 = vld [vmem:[%s1977_s27 + $0x7a8] sm:$0xff]  ;;  %v1902_v59 = vld [vmem:[%s1977_s27 + $0x7b0] sm:$0xff] }
 0x2ca   : > { %1495 = vst [vmem:[%s2358_s15 + $0x6b8] sm:$0xff] %v1239_v33  ;;  %1496 = vst [vmem:[%s2358_s15 + $0x6c0] sm:$0xff] %v1240_v62  ;;  %v1269_v57 = vmul.f32 %v1901_v55, %v3014_v2  ;;  %v1270_v63 = vmul.f32 %v1902_v59, %v3014_v2  ;;  %v1903_v33 = vld [vmem:[%s1977_s27 + $0x7b8] sm:$0xff]  ;;  %v1904_v62 = vld [vmem:[%s1977_s27 + $0x7c0] sm:$0xff] }
 0x2cb   : > { %1497 = vst [vmem:[%s2358_s15 + $0x6c8] sm:$0xff] %v1241_v21  ;;  %1498 = vst [vmem:[%s2358_s15 + $0x6d0] sm:$0xff] %v1242_v34  ;;  %v1271_v50 = vmul.f32 %v1903_v33, %v3014_v2  ;;  %v1272_v10 = vmul.f32 %v1904_v62, %v3014_v2  ;;  %v1905_v21 = vld [vmem:[%s1977_s27 + $0x7c8] sm:$0xff]  ;;  %v1906_v34 = vld [vmem:[%s1977_s27 + $0x7d0] sm:$0xff] }
 0x2cc   : > { %1499 = vst [vmem:[%s2358_s15 + $0x6d8] sm:$0xff] %v1243_v1  ;;  %1500 = vst [vmem:[%s2358_s15 + $0x6e0] sm:$0xff] %v1244_v61  ;;  %v1273_v27 = vmul.f32 %v1905_v21, %v3014_v2  ;;  %v1274_v52 = vmul.f32 %v1906_v34, %v3014_v2  ;;  %v1907_v1 = vld [vmem:[%s1977_s27 + $0x7d8] sm:$0xff]  ;;  %v1908_v61 = vld [vmem:[%s1977_s27 + $0x7e0] sm:$0xff] }
 0x2cd   : > { %1501 = vst [vmem:[%s2358_s15 + $0x6e8] sm:$0xff] %v1245_v54  ;;  %1502 = vst [vmem:[%s2358_s15 + $0x6f0] sm:$0xff] %v1246_v56  ;;  %v1275_v3 = vmul.f32 %v1907_v1, %v3014_v2  ;;  %v1276_v4 = vmul.f32 %v1908_v61, %v3014_v2  ;;  %v1909_v54 = vld [vmem:[%s1977_s27 + $0x7e8] sm:$0xff]  ;;  %v1910_v56 = vld [vmem:[%s1977_s27 + $0x7f0] sm:$0xff] }
 0x2ce   : > { %1503 = vst [vmem:[%s2358_s15 + $0x6f8] sm:$0xff] %v1247_v58  ;;  %1504 = vst [vmem:[%s2358_s15 + $0x700] sm:$0xff] %v1248_v60  ;;  %v1277_v5 = vmul.f32 %v1909_v54, %v3014_v2  ;;  %v1278_v6 = vmul.f32 %v1910_v56, %v3014_v2  ;;  %v1911_v58 = vld [vmem:[%s1977_s27 + $0x7f8] sm:$0xff] }
 0x2cf   : > { %1505 = vst [vmem:[%s2358_s15 + $0x708] sm:$0xff] %v1249_v0  ;;  %1506 = vst [vmem:[%s2358_s15 + $0x710] sm:$0xff] %v1250_v11  ;;  %v1279_v7 = vmul.f32 %v1911_v58, %v3014_v2 }
 0x2d0   : > { %1507 = vst [vmem:[%s2358_s15 + $0x718] sm:$0xff] %v1251_v13  ;;  %1508 = vst [vmem:[%s2358_s15 + $0x720] sm:$0xff] %v1252_v15 }
 0x2d1   : > { %1509 = vst [vmem:[%s2358_s15 + $0x728] sm:$0xff] %v1253_v17  ;;  %1510 = vst [vmem:[%s2358_s15 + $0x730] sm:$0xff] %v1254_v19 }
 0x2d2   : > { %1511 = vst [vmem:[%s2358_s15 + $0x738] sm:$0xff] %v1255_v22  ;;  %1512 = vst [vmem:[%s2358_s15 + $0x740] sm:$0xff] %v1256_v24 }
 0x2d3   : > { %1513 = vst [vmem:[%s2358_s15 + $0x748] sm:$0xff] %v1257_v26  ;;  %1514 = vst [vmem:[%s2358_s15 + $0x750] sm:$0xff] %v1258_v29 }
 0x2d4   : > { %1515 = vst [vmem:[%s2358_s15 + $0x758] sm:$0xff] %v1259_v31  ;;  %1516 = vst [vmem:[%s2358_s15 + $0x760] sm:$0xff] %v1260_v35 }
 0x2d5   : > { %1517 = vst [vmem:[%s2358_s15 + $0x768] sm:$0xff] %v1261_v37  ;;  %1518 = vst [vmem:[%s2358_s15 + $0x770] sm:$0xff] %v1262_v39 }
 0x2d6   : > { %1519 = vst [vmem:[%s2358_s15 + $0x778] sm:$0xff] %v1263_v41  ;;  %1520 = vst [vmem:[%s2358_s15 + $0x780] sm:$0xff] %v1264_v43 }
 0x2d7   : > { %1521 = vst [vmem:[%s2358_s15 + $0x788] sm:$0xff] %v1265_v45  ;;  %1522 = vst [vmem:[%s2358_s15 + $0x790] sm:$0xff] %v1266_v47 }
 0x2d8   : > { %1523 = vst [vmem:[%s2358_s15 + $0x798] sm:$0xff] %v1267_v49  ;;  %1524 = vst [vmem:[%s2358_s15 + $0x7a0] sm:$0xff] %v1268_v53 }
 0x2d9   : > { %1525 = vst [vmem:[%s2358_s15 + $0x7a8] sm:$0xff] %v1269_v57  ;;  %1526 = vst [vmem:[%s2358_s15 + $0x7b0] sm:$0xff] %v1270_v63 }
 0x2da   : > { %1527 = vst [vmem:[%s2358_s15 + $0x7b8] sm:$0xff] %v1271_v50  ;;  %1528 = vst [vmem:[%s2358_s15 + $0x7c0] sm:$0xff] %v1272_v10 }
 0x2db   : > { %1529 = vst [vmem:[%s2358_s15 + $0x7c8] sm:$0xff] %v1273_v27  ;;  %1530 = vst [vmem:[%s2358_s15 + $0x7d0] sm:$0xff] %v1274_v52 }
 0x2dc   : > { %1531 = vst [vmem:[%s2358_s15 + $0x7d8] sm:$0xff] %v1275_v3  ;;  %1532 = vst [vmem:[%s2358_s15 + $0x7e0] sm:$0xff] %v1276_v4 }
 0x2dd   : > { %1533 = vst [vmem:[%s2358_s15 + $0x7e8] sm:$0xff] %v1277_v5  ;;  %1534 = vst [vmem:[%s2358_s15 + $0x7f0] sm:$0xff] %v1278_v6 }
 0x2de   : > { %1535 = vst [vmem:[%s2358_s15 + $0x7f8] sm:$0xff] %v1279_v7 }
 0x2df PF: > { %s17_s23 = sadd.s32 1, %s1918_s23  }
 0x2e0   : > { %p14_p4 = scmp.ge.s32.totalorder %s17_s23, 4  }
 0x2e2   :  { %16 = sbr.rel (!%p14_p4) target bundleno = 1 (0x1), region = 84 }

</bundles_post_ra>
